<compile_context>
chip_gen: v7x
topology: tpu7x:2x2x1
jax: 0.10.0
libtpu: 0.0.40
codegen_flags: <defaults>
</compile_context>

<pallas_src>
import functools

import numpy as np

import jax
import jax.numpy as jnp
from jax import lax
from jax.experimental import pallas as pl
from jax.experimental.pallas import tpu as pltpu

EPS = 1e-5  # nn.GroupNorm default


# --------------------------- static helpers (wrapper-time) ---------------------------
def _tap_shifts(H, W):
    """Roll shift (per image, flattened HW axis) for each of the 9 taps, (oy, ox) order."""
    P = H * W
    shifts = []
    for oy in (-1, 0, 1):
        for ox in (-1, 0, 1):
            d = oy * W + ox
            shifts.append((-d) % P)          # 0 only for the center tap
    return shifts


def _make_border_masks(H, W):
    """(8, P) f32 zero-padding masks for the 8 non-center taps, (oy, ox) order."""
    P = H * W
    hp = np.arange(P) // W
    wp = np.arange(P) % W
    rows = []
    for oy in (-1, 0, 1):
        for ox in (-1, 0, 1):
            if oy == 0 and ox == 0:
                continue
            m = np.ones((P,), np.float32)
            if oy == -1:
                m = m * (hp >= 1)
            elif oy == 1:
                m = m * (hp <= H - 2)
            if ox == -1:
                m = m * (wp >= 1)
            elif ox == 1:
                m = m * (wp <= W - 2)
            rows.append(m.astype(np.float32))
    return jnp.asarray(np.stack(rows, axis=0), dtype=jnp.float32)


# --------------------------------- kernel body ---------------------------------------
def _group_norm(y, gamma, beta, num_groups, Bt, P):
    """GroupNorm over a (C, Bt*P) tile (images concatenated along lanes).

    Stats are per image, per group (group size C // num_groups); gamma/beta are (C, 1).
    """
    C, _ = y.shape
    cg = C // num_groups
    denom = float(cg * P)
    group_parts = []
    for g in range(num_groups):
        yg = y[g * cg:(g + 1) * cg, :]                       # sublane-aligned slice
        img_parts = []
        for i in range(Bt):
            yi = yg[:, i * P:(i + 1) * P]                    # lane-aligned slice
            s = jnp.sum(jnp.sum(yi, axis=1, keepdims=True), axis=0, keepdims=True)
            mean = s / denom
            d = yi - mean                                    # centered, two-pass var
            v = jnp.sum(jnp.sum(d * d, axis=1, keepdims=True),
                        axis=0, keepdims=True) / denom
            img_parts.append(d * lax.rsqrt(v + EPS))
        group_parts.append(jnp.concatenate(img_parts, axis=1) if Bt > 1
                           else img_parts[0])
    yn = (jnp.concatenate(group_parts, axis=0) if num_groups > 1
          else group_parts[0])
    return yn * gamma + beta


def _resblock_kernel(x_ref, w1_ref, w2_ref, params_ref, masks_ref, out_ref,
                     *, H, W, num_groups, Bt):
    P = H * W
    shifts = _tap_shifts(H, W)                               # static python ints

    # packed per-channel params: columns [b1, g1, be1, b2, g2, be2]
    b1 = params_ref[:, 0:1]
    g1 = params_ref[:, 1:2]
    be1 = params_ref[:, 2:3]
    b2 = params_ref[:, 3:4]
    g2 = params_ref[:, 4:5]
    be2 = params_ref[:, 5:6]

    # hoisted border masks, one (1, P) row per non-center tap
    masks = [masks_ref[m:m + 1, :] for m in range(8)]

    def im2col(img):                                         # img: (C, P) -> (9C, P)
        cols = []
        mi = 0
        for shift in shifts:
            if shift == 0:                                   # center tap: no shift/mask
                cols.append(img)
            else:
                cols.append(pltpu.roll(img, shift=shift, axis=1) * masks[mi])
                mi += 1
        return jnp.concatenate(cols, axis=0)

    # ---- conv1 (3x3, pad=1): one matmul over all Bt images, + GroupNorm + ReLU ----
    cols1 = jnp.concatenate([im2col(x_ref[i]) for i in range(Bt)], axis=1)  # (9Cin, Bt*P)
    y = jnp.dot(w1_ref[...], cols1, preferred_element_type=jnp.float32) + b1
    y = jnp.maximum(_group_norm(y, g1, be1, num_groups, Bt, P), 0.0)

    # ---- conv2 (3x3, pad=1) + GroupNorm + ReLU ----
    cols2 = jnp.concatenate([im2col(y[:, i * P:(i + 1) * P]) for i in range(Bt)],
                            axis=1)                                          # (9C, Bt*P)
    y = jnp.dot(w2_ref[...], cols2, preferred_element_type=jnp.float32) + b2
    y = jnp.maximum(_group_norm(y, g2, be2, num_groups, Bt, P), 0.0)

    # ---- residual add + final relu (stride==1, channels match) ----
    for i in range(Bt):
        out_ref[i] = jnp.maximum(x_ref[i] + y[:, i * P:(i + 1) * P], 0.0)


# ----------------------------------- wrapper ------------------------------------------
def residual_block_pallas(x_nchw, w1, b1, g1, be1, w2, b2, g2, be2, num_groups,
                          batch_tile=None):
    """x_nchw: (N, C, H, W) float32 (PyTorch layout). w1/w2: HWIO (3, 3, Cin, Cout)."""
    N, Cin, H, W = x_nchw.shape
    Cout = w1.shape[-1]
    P = H * W
    assert Cin == Cout, "residual path requires in_planes == planes"
    assert Cout % num_groups == 0, "GroupNorm requires C % num_groups == 0"

    if batch_tile is None:
        # Keep >= 2 grid steps so v7x can shard the batch over its 2 TensorCores.
        # On single-TC chips (v5e/v6e) batch_tile=N (a single step) is best.
        batch_tile = max(1, N // 2)
    Bt = batch_tile
    assert N % Bt == 0, "batch must divide evenly into batch tiles"

    x_flat = x_nchw.reshape(N, Cin, P)                       # free reshape (no copy)

    # im2col weights: (Cout, 9*Cin), tap-major to match the in-kernel stacking order.
    w1_big = w1.reshape(9 * Cin, Cout).T
    w2_big = w2.reshape(9 * Cout, Cout).T
    params = jnp.stack([b1, g1, be1, b2, g2, be2], axis=1)   # (Cout, 6) packed
    masks = _make_border_masks(H, W)                         # (8, P), resident in VMEM

    const = lambda n: (0, 0)

    out = pl.pallas_call(
        functools.partial(_resblock_kernel, H=H, W=W,
                          num_groups=num_groups, Bt=Bt),
        out_shape=jax.ShapeDtypeStruct((N, Cout, P), jnp.float32),
        grid_spec=pltpu.PrefetchScalarGridSpec(
            num_scalar_prefetch=0,
            grid=(N // Bt,),
            in_specs=[
                pl.BlockSpec((Bt, Cin, P), lambda n: (n, 0, 0)),
                pl.BlockSpec((Cout, 9 * Cin), const),
                pl.BlockSpec((Cout, 9 * Cout), const),
                pl.BlockSpec((Cout, 6), const),
                pl.BlockSpec((8, P), const),
            ],
            out_specs=pl.BlockSpec((Bt, Cout, P), lambda n: (n, 0, 0)),
        ),
        compiler_params=pltpu.CompilerParams(
            dimension_semantics=("parallel",)),   # v7x: shard batch over 2 TCs
    )(x_flat, w1_big, w2_big, params, masks)

    return out.reshape(N, Cout, H, W)


# ----------------------- pure-JAX reference (for checking) -----------------------
def _conv3x3_ref(x, w, b):
    y = lax.conv_general_dilated(
        x, w, window_strides=(1, 1), padding=((1, 1), (1, 1)),
        dimension_numbers=('NCHW', 'HWIO', 'NCHW'))
    return y + b[None, :, None, None]


def _gn_ref(x, gamma, beta, G):
    N, C, H, W = x.shape
    xg = x.reshape(N, G, C // G, H, W)
    mean = xg.mean(axis=(2, 3, 4), keepdims=True)
    var = xg.var(axis=(2, 3, 4), keepdims=True)
    xn = ((xg - mean) / jnp.sqrt(var + EPS)).reshape(N, C, H, W)
    return xn * gamma[None, :, None, None] + beta[None, :, None, None]


def residual_block_ref(x, w1, b1, g1, be1, w2, b2, g2, be2, G):
    y = jax.nn.relu(_gn_ref(_conv3x3_ref(x, w1, b1), g1, be1, G))
    y = jax.nn.relu(_gn_ref(_conv3x3_ref(y, w2, b2), g2, be2, G))
    return jax.nn.relu(x + y)


if __name__ == "__main__":
    # in_planes = planes = 16, stride = 1, norm_fn = 'group' -> num_groups = 2
    N, C, H, W = 4, 16, 16, 16
    G = C // 8

    key = jax.random.PRNGKey(0)
    k = jax.random.split(key, 6)
    x = jax.random.normal(k[0], (N, C, H, W), jnp.float32)          # NCHW, like PyTorch

    # deterministic synthetic parameters (shapes per the module __init__)
    w1 = jax.random.normal(k[1], (3, 3, C, C), jnp.float32) * 0.1   # HWIO
    b1 = jax.random.normal(k[2], (C,), jnp.float32) * 0.05
    w2 = jax.random.normal(k[3], (3, 3, C, C), jnp.float32) * 0.1
    b2 = jax.random.normal(k[4], (C,), jnp.float32) * 0.05
    g1, be1 = jnp.ones((C,), jnp.float32), jnp.zeros((C,), jnp.float32)  # GN affine defaults
    g2, be2 = jnp.ones((C,), jnp.float32), jnp.zeros((C,), jnp.float32)

    # batch_tile=2 -> grid of 2 steps (exercises batch tiling, keeps 2 steps for v7x)
    out = residual_block_pallas(x, w1, b1, g1, be1, w2, b2, g2, be2, G, batch_tile=2)
    out = jax.block_until_ready(out)

    ref = residual_block_ref(x, w1, b1, g1, be1, w2, b2, g2, be2, G)
    ref = jax.block_until_ready(ref)

    assert out.shape == (N, C, H, W)
    assert jnp.allclose(out, ref, rtol=1e-4, atol=1e-4), \
        f"max abs err = {jnp.max(jnp.abs(out - ref))}"

    print("KERNEL_OK")
</pallas_src>

<mosaic_0001>
module attributes {stable_mosaic.version = 11 : i64} {
  func.func @_resblock_kernel(%arg0: i32, %arg1: memref<2x16x256xf32, #tpu.memory_space<vmem>>, %arg2: memref<16x144xf32, #tpu.memory_space<vmem>>, %arg3: memref<16x144xf32, #tpu.memory_space<vmem>>, %arg4: memref<16x6xf32, #tpu.memory_space<vmem>>, %arg5: memref<8x256xf32, #tpu.memory_space<vmem>>, %arg6: memref<2x16x256xf32, #tpu.memory_space<vmem>>) attributes {dimension_semantics = [#tpu.dimension_semantics<parallel>], iteration_bounds = array<i64: 2>, scalar_prefetch = 0 : i64, scratch_operands = 0 : i64, tpu.core_type = #tpu.core_type<tc>, window_params = [{transform_indices = @transform_0, window_bounds = array<i64: 2, 16, 256>}, {pipeline_mode = #tpu.pipeline_mode<synchronous>, transform_indices = @transform_1, window_bounds = array<i64: 16, 144>}, {pipeline_mode = #tpu.pipeline_mode<synchronous>, transform_indices = @transform_2, window_bounds = array<i64: 16, 144>}, {pipeline_mode = #tpu.pipeline_mode<synchronous>, transform_indices = @transform_3, window_bounds = array<i64: 16, 6>}, {pipeline_mode = #tpu.pipeline_mode<synchronous>, transform_indices = @transform_4, window_bounds = array<i64: 8, 256>}, {transform_indices = @transform_5, window_bounds = array<i64: 2, 16, 256>}]} {
    %c0 = arith.constant 0 : index
    %c0_0 = arith.constant 0 : index
    %0 = vector.load %arg4[%c0, %c0_0] : memref<16x6xf32, #tpu.memory_space<vmem>>, vector<16x1xf32>
    %c0_1 = arith.constant 0 : index
    %c1 = arith.constant 1 : index
    %1 = vector.load %arg4[%c0_1, %c1] : memref<16x6xf32, #tpu.memory_space<vmem>>, vector<16x1xf32>
    %c0_2 = arith.constant 0 : index
    %c2 = arith.constant 2 : index
    %2 = vector.load %arg4[%c0_2, %c2] : memref<16x6xf32, #tpu.memory_space<vmem>>, vector<16x1xf32>
    %c0_3 = arith.constant 0 : index
    %c3 = arith.constant 3 : index
    %3 = vector.load %arg4[%c0_3, %c3] : memref<16x6xf32, #tpu.memory_space<vmem>>, vector<16x1xf32>
    %c0_4 = arith.constant 0 : index
    %c4 = arith.constant 4 : index
    %4 = vector.load %arg4[%c0_4, %c4] : memref<16x6xf32, #tpu.memory_space<vmem>>, vector<16x1xf32>
    %c0_5 = arith.constant 0 : index
    %c5 = arith.constant 5 : index
    %5 = vector.load %arg4[%c0_5, %c5] : memref<16x6xf32, #tpu.memory_space<vmem>>, vector<16x1xf32>
    %c0_6 = arith.constant 0 : index
    %c0_7 = arith.constant 0 : index
    %6 = vector.load %arg5[%c0_6, %c0_7] : memref<8x256xf32, #tpu.memory_space<vmem>>, vector<1x256xf32>
    %c1_8 = arith.constant 1 : index
    %c0_9 = arith.constant 0 : index
    %7 = vector.load %arg5[%c1_8, %c0_9] : memref<8x256xf32, #tpu.memory_space<vmem>>, vector<1x256xf32>
    %c2_10 = arith.constant 2 : index
    %c0_11 = arith.constant 0 : index
    %8 = vector.load %arg5[%c2_10, %c0_11] : memref<8x256xf32, #tpu.memory_space<vmem>>, vector<1x256xf32>
    %c3_12 = arith.constant 3 : index
    %c0_13 = arith.constant 0 : index
    %9 = vector.load %arg5[%c3_12, %c0_13] : memref<8x256xf32, #tpu.memory_space<vmem>>, vector<1x256xf32>
    %c4_14 = arith.constant 4 : index
    %c0_15 = arith.constant 0 : index
    %10 = vector.load %arg5[%c4_14, %c0_15] : memref<8x256xf32, #tpu.memory_space<vmem>>, vector<1x256xf32>
    %c5_16 = arith.constant 5 : index
    %c0_17 = arith.constant 0 : index
    %11 = vector.load %arg5[%c5_16, %c0_17] : memref<8x256xf32, #tpu.memory_space<vmem>>, vector<1x256xf32>
    %c6 = arith.constant 6 : index
    %c0_18 = arith.constant 0 : index
    %12 = vector.load %arg5[%c6, %c0_18] : memref<8x256xf32, #tpu.memory_space<vmem>>, vector<1x256xf32>
    %c7 = arith.constant 7 : index
    %c0_19 = arith.constant 0 : index
    %13 = vector.load %arg5[%c7, %c0_19] : memref<8x256xf32, #tpu.memory_space<vmem>>, vector<1x256xf32>
    %c0_20 = arith.constant 0 : index
    %c0_21 = arith.constant 0 : index
    %c0_22 = arith.constant 0 : index
    %14 = vector.load %arg1[%c0_20, %c0_21, %c0_22] : memref<2x16x256xf32, #tpu.memory_space<vmem>>, vector<1x16x256xf32>
    %15 = vector.shape_cast %14 : vector<1x16x256xf32> to vector<16x256xf32>
    %c17_i32 = arith.constant 17 : i32
    %16 = tpu.dynamic_rotate %15 by %c17_i32 dim 1 : vector<16x256xf32>, i32 -> vector<16x256xf32>
    %17 = vector.broadcast %6 : vector<1x256xf32> to vector<16x256xf32>
    %18 = arith.mulf %16, %17 : vector<16x256xf32>
    %c16_i32 = arith.constant 16 : i32
    %19 = tpu.dynamic_rotate %15 by %c16_i32 dim 1 : vector<16x256xf32>, i32 -> vector<16x256xf32>
    %20 = vector.broadcast %7 : vector<1x256xf32> to vector<16x256xf32>
    %21 = arith.mulf %19, %20 : vector<16x256xf32>
    %c15_i32 = arith.constant 15 : i32
    %22 = tpu.dynamic_rotate %15 by %c15_i32 dim 1 : vector<16x256xf32>, i32 -> vector<16x256xf32>
    %23 = vector.broadcast %8 : vector<1x256xf32> to vector<16x256xf32>
    %24 = arith.mulf %22, %23 : vector<16x256xf32>
    %c1_i32 = arith.constant 1 : i32
    %25 = tpu.dynamic_rotate %15 by %c1_i32 dim 1 : vector<16x256xf32>, i32 -> vector<16x256xf32>
    %26 = vector.broadcast %9 : vector<1x256xf32> to vector<16x256xf32>
    %27 = arith.mulf %25, %26 : vector<16x256xf32>
    %c255_i32 = arith.constant 255 : i32
    %28 = tpu.dynamic_rotate %15 by %c255_i32 dim 1 : vector<16x256xf32>, i32 -> vector<16x256xf32>
    %29 = vector.broadcast %10 : vector<1x256xf32> to vector<16x256xf32>
    %30 = arith.mulf %28, %29 : vector<16x256xf32>
    %c241_i32 = arith.constant 241 : i32
    %31 = tpu.dynamic_rotate %15 by %c241_i32 dim 1 : vector<16x256xf32>, i32 -> vector<16x256xf32>
    %32 = vector.broadcast %11 : vector<1x256xf32> to vector<16x256xf32>
    %33 = arith.mulf %31, %32 : vector<16x256xf32>
    %c240_i32 = arith.constant 240 : i32
    %34 = tpu.dynamic_rotate %15 by %c240_i32 dim 1 : vector<16x256xf32>, i32 -> vector<16x256xf32>
    %35 = vector.broadcast %12 : vector<1x256xf32> to vector<16x256xf32>
    %36 = arith.mulf %34, %35 : vector<16x256xf32>
    %c239_i32 = arith.constant 239 : i32
    %37 = tpu.dynamic_rotate %15 by %c239_i32 dim 1 : vector<16x256xf32>, i32 -> vector<16x256xf32>
    %38 = vector.broadcast %13 : vector<1x256xf32> to vector<16x256xf32>
    %39 = arith.mulf %37, %38 : vector<16x256xf32>
    %40 = tpu.concatenate %18, %21, %24, %27, %15, %30, %33, %36, %39 in 0 : vector<16x256xf32>, vector<16x256xf32>, vector<16x256xf32>, vector<16x256xf32>, vector<16x256xf32>, vector<16x256xf32>, vector<16x256xf32>, vector<16x256xf32>, vector<16x256xf32> -> vector<144x256xf32>
    %c1_23 = arith.constant 1 : index
    %c0_24 = arith.constant 0 : index
    %c0_25 = arith.constant 0 : index
    %41 = vector.load %arg1[%c1_23, %c0_24, %c0_25] : memref<2x16x256xf32, #tpu.memory_space<vmem>>, vector<1x16x256xf32>
    %42 = vector.shape_cast %41 : vector<1x16x256xf32> to vector<16x256xf32>
    %c17_i32_26 = arith.constant 17 : i32
    %43 = tpu.dynamic_rotate %42 by %c17_i32_26 dim 1 : vector<16x256xf32>, i32 -> vector<16x256xf32>
    %44 = vector.broadcast %6 : vector<1x256xf32> to vector<16x256xf32>
    %45 = arith.mulf %43, %44 : vector<16x256xf32>
    %c16_i32_27 = arith.constant 16 : i32
    %46 = tpu.dynamic_rotate %42 by %c16_i32_27 dim 1 : vector<16x256xf32>, i32 -> vector<16x256xf32>
    %47 = vector.broadcast %7 : vector<1x256xf32> to vector<16x256xf32>
    %48 = arith.mulf %46, %47 : vector<16x256xf32>
    %c15_i32_28 = arith.constant 15 : i32
    %49 = tpu.dynamic_rotate %42 by %c15_i32_28 dim 1 : vector<16x256xf32>, i32 -> vector<16x256xf32>
    %50 = vector.broadcast %8 : vector<1x256xf32> to vector<16x256xf32>
    %51 = arith.mulf %49, %50 : vector<16x256xf32>
    %c1_i32_29 = arith.constant 1 : i32
    %52 = tpu.dynamic_rotate %42 by %c1_i32_29 dim 1 : vector<16x256xf32>, i32 -> vector<16x256xf32>
    %53 = vector.broadcast %9 : vector<1x256xf32> to vector<16x256xf32>
    %54 = arith.mulf %52, %53 : vector<16x256xf32>
    %c255_i32_30 = arith.constant 255 : i32
    %55 = tpu.dynamic_rotate %42 by %c255_i32_30 dim 1 : vector<16x256xf32>, i32 -> vector<16x256xf32>
    %56 = vector.broadcast %10 : vector<1x256xf32> to vector<16x256xf32>
    %57 = arith.mulf %55, %56 : vector<16x256xf32>
    %c241_i32_31 = arith.constant 241 : i32
    %58 = tpu.dynamic_rotate %42 by %c241_i32_31 dim 1 : vector<16x256xf32>, i32 -> vector<16x256xf32>
    %59 = vector.broadcast %11 : vector<1x256xf32> to vector<16x256xf32>
    %60 = arith.mulf %58, %59 : vector<16x256xf32>
    %c240_i32_32 = arith.constant 240 : i32
    %61 = tpu.dynamic_rotate %42 by %c240_i32_32 dim 1 : vector<16x256xf32>, i32 -> vector<16x256xf32>
    %62 = vector.broadcast %12 : vector<1x256xf32> to vector<16x256xf32>
    %63 = arith.mulf %61, %62 : vector<16x256xf32>
    %c239_i32_33 = arith.constant 239 : i32
    %64 = tpu.dynamic_rotate %42 by %c239_i32_33 dim 1 : vector<16x256xf32>, i32 -> vector<16x256xf32>
    %65 = vector.broadcast %13 : vector<1x256xf32> to vector<16x256xf32>
    %66 = arith.mulf %64, %65 : vector<16x256xf32>
    %67 = tpu.concatenate %45, %48, %51, %54, %42, %57, %60, %63, %66 in 0 : vector<16x256xf32>, vector<16x256xf32>, vector<16x256xf32>, vector<16x256xf32>, vector<16x256xf32>, vector<16x256xf32>, vector<16x256xf32>, vector<16x256xf32>, vector<16x256xf32> -> vector<144x256xf32>
    %68 = tpu.concatenate %40, %67 in 1 : vector<144x256xf32>, vector<144x256xf32> -> vector<144x512xf32>
    %c0_34 = arith.constant 0 : index
    %c0_35 = arith.constant 0 : index
    %69 = vector.load %arg2[%c0_34, %c0_35] : memref<16x144xf32, #tpu.memory_space<vmem>>, vector<16x144xf32>
    %cst = arith.constant dense<0.000000e+00> : vector<16x512xf32>
    %70 = tpu.matmul %69, %68, %cst {dimension_numbers = #tpu.dot_dimension_numbers<[1], [0], [0], [1], [0, 0, 1, 1], [], []>} : vector<16x144xf32>, vector<144x512xf32>, vector<16x512xf32> -> vector<16x512xf32>
    %71 = vector.broadcast %0 : vector<16x1xf32> to vector<16x512xf32>
    %72 = arith.addf %70, %71 : vector<16x512xf32>
    %73 = vector.extract_strided_slice %72 {offsets = [0, 0], sizes = [8, 512], strides = [1, 1]} : vector<16x512xf32> to vector<8x512xf32>
    %74 = vector.extract_strided_slice %73 {offsets = [0, 0], sizes = [8, 256], strides = [1, 1]} : vector<8x512xf32> to vector<8x256xf32>
    %cst_36 = arith.constant dense<0.000000e+00> : vector<8xf32>
    %75 = vector.multi_reduction <add>, %74, %cst_36 [1] : vector<8x256xf32> to vector<8xf32>
    %76 = vector.shape_cast %75 : vector<8xf32> to vector<8x1xf32>
    %cst_37 = arith.constant dense<0.000000e+00> : vector<1xf32>
    %77 = vector.multi_reduction <add>, %76, %cst_37 [0] : vector<8x1xf32> to vector<1xf32>
    %78 = vector.shape_cast %77 : vector<1xf32> to vector<1x1xf32>
    %cst_38 = arith.constant 2.048000e+03 : f32
    %79 = vector.broadcast %cst_38 : f32 to vector<1x1xf32>
    %80 = arith.divf %78, %79 : vector<1x1xf32>
    %81 = vector.broadcast %80 : vector<1x1xf32> to vector<8x256xf32>
    %82 = arith.subf %74, %81 : vector<8x256xf32>
    %83 = arith.mulf %82, %82 : vector<8x256xf32>
    %cst_39 = arith.constant dense<0.000000e+00> : vector<8xf32>
    %84 = vector.multi_reduction <add>, %83, %cst_39 [1] : vector<8x256xf32> to vector<8xf32>
    %85 = vector.shape_cast %84 : vector<8xf32> to vector<8x1xf32>
    %cst_40 = arith.constant dense<0.000000e+00> : vector<1xf32>
    %86 = vector.multi_reduction <add>, %85, %cst_40 [0] : vector<8x1xf32> to vector<1xf32>
    %87 = vector.shape_cast %86 : vector<1xf32> to vector<1x1xf32>
    %cst_41 = arith.constant 2.048000e+03 : f32
    %88 = vector.broadcast %cst_41 : f32 to vector<1x1xf32>
    %89 = arith.divf %87, %88 : vector<1x1xf32>
    %cst_42 = arith.constant 9.99999974E-6 : f32
    %90 = vector.broadcast %cst_42 : f32 to vector<1x1xf32>
    %91 = arith.addf %89, %90 : vector<1x1xf32>
    %92 = math.rsqrt %91 : vector<1x1xf32>
    %93 = vector.broadcast %92 : vector<1x1xf32> to vector<8x256xf32>
    %94 = arith.mulf %82, %93 : vector<8x256xf32>
    %95 = vector.extract_strided_slice %73 {offsets = [0, 256], sizes = [8, 256], strides = [1, 1]} : vector<8x512xf32> to vector<8x256xf32>
    %cst_43 = arith.constant dense<0.000000e+00> : vector<8xf32>
    %96 = vector.multi_reduction <add>, %95, %cst_43 [1] : vector<8x256xf32> to vector<8xf32>
    %97 = vector.shape_cast %96 : vector<8xf32> to vector<8x1xf32>
    %cst_44 = arith.constant dense<0.000000e+00> : vector<1xf32>
    %98 = vector.multi_reduction <add>, %97, %cst_44 [0] : vector<8x1xf32> to vector<1xf32>
    %99 = vector.shape_cast %98 : vector<1xf32> to vector<1x1xf32>
    %cst_45 = arith.constant 2.048000e+03 : f32
    %100 = vector.broadcast %cst_45 : f32 to vector<1x1xf32>
    %101 = arith.divf %99, %100 : vector<1x1xf32>
    %102 = vector.broadcast %101 : vector<1x1xf32> to vector<8x256xf32>
    %103 = arith.subf %95, %102 : vector<8x256xf32>
    %104 = arith.mulf %103, %103 : vector<8x256xf32>
    %cst_46 = arith.constant dense<0.000000e+00> : vector<8xf32>
    %105 = vector.multi_reduction <add>, %104, %cst_46 [1] : vector<8x256xf32> to vector<8xf32>
    %106 = vector.shape_cast %105 : vector<8xf32> to vector<8x1xf32>
    %cst_47 = arith.constant dense<0.000000e+00> : vector<1xf32>
    %107 = vector.multi_reduction <add>, %106, %cst_47 [0] : vector<8x1xf32> to vector<1xf32>
    %108 = vector.shape_cast %107 : vector<1xf32> to vector<1x1xf32>
    %cst_48 = arith.constant 2.048000e+03 : f32
    %109 = vector.broadcast %cst_48 : f32 to vector<1x1xf32>
    %110 = arith.divf %108, %109 : vector<1x1xf32>
    %cst_49 = arith.constant 9.99999974E-6 : f32
    %111 = vector.broadcast %cst_49 : f32 to vector<1x1xf32>
    %112 = arith.addf %110, %111 : vector<1x1xf32>
    %113 = math.rsqrt %112 : vector<1x1xf32>
    %114 = vector.broadcast %113 : vector<1x1xf32> to vector<8x256xf32>
    %115 = arith.mulf %103, %114 : vector<8x256xf32>
    %116 = tpu.concatenate %94, %115 in 1 : vector<8x256xf32>, vector<8x256xf32> -> vector<8x512xf32>
    %117 = vector.extract_strided_slice %72 {offsets = [8, 0], sizes = [8, 512], strides = [1, 1]} : vector<16x512xf32> to vector<8x512xf32>
    %118 = vector.extract_strided_slice %117 {offsets = [0, 0], sizes = [8, 256], strides = [1, 1]} : vector<8x512xf32> to vector<8x256xf32>
    %cst_50 = arith.constant dense<0.000000e+00> : vector<8xf32>
    %119 = vector.multi_reduction <add>, %118, %cst_50 [1] : vector<8x256xf32> to vector<8xf32>
    %120 = vector.shape_cast %119 : vector<8xf32> to vector<8x1xf32>
    %cst_51 = arith.constant dense<0.000000e+00> : vector<1xf32>
    %121 = vector.multi_reduction <add>, %120, %cst_51 [0] : vector<8x1xf32> to vector<1xf32>
    %122 = vector.shape_cast %121 : vector<1xf32> to vector<1x1xf32>
    %cst_52 = arith.constant 2.048000e+03 : f32
    %123 = vector.broadcast %cst_52 : f32 to vector<1x1xf32>
    %124 = arith.divf %122, %123 : vector<1x1xf32>
    %125 = vector.broadcast %124 : vector<1x1xf32> to vector<8x256xf32>
    %126 = arith.subf %118, %125 : vector<8x256xf32>
    %127 = arith.mulf %126, %126 : vector<8x256xf32>
    %cst_53 = arith.constant dense<0.000000e+00> : vector<8xf32>
    %128 = vector.multi_reduction <add>, %127, %cst_53 [1] : vector<8x256xf32> to vector<8xf32>
    %129 = vector.shape_cast %128 : vector<8xf32> to vector<8x1xf32>
    %cst_54 = arith.constant dense<0.000000e+00> : vector<1xf32>
    %130 = vector.multi_reduction <add>, %129, %cst_54 [0] : vector<8x1xf32> to vector<1xf32>
    %131 = vector.shape_cast %130 : vector<1xf32> to vector<1x1xf32>
    %cst_55 = arith.constant 2.048000e+03 : f32
    %132 = vector.broadcast %cst_55 : f32 to vector<1x1xf32>
    %133 = arith.divf %131, %132 : vector<1x1xf32>
    %cst_56 = arith.constant 9.99999974E-6 : f32
    %134 = vector.broadcast %cst_56 : f32 to vector<1x1xf32>
    %135 = arith.addf %133, %134 : vector<1x1xf32>
    %136 = math.rsqrt %135 : vector<1x1xf32>
    %137 = vector.broadcast %136 : vector<1x1xf32> to vector<8x256xf32>
    %138 = arith.mulf %126, %137 : vector<8x256xf32>
    %139 = vector.extract_strided_slice %117 {offsets = [0, 256], sizes = [8, 256], strides = [1, 1]} : vector<8x512xf32> to vector<8x256xf32>
    %cst_57 = arith.constant dense<0.000000e+00> : vector<8xf32>
    %140 = vector.multi_reduction <add>, %139, %cst_57 [1] : vector<8x256xf32> to vector<8xf32>
    %141 = vector.shape_cast %140 : vector<8xf32> to vector<8x1xf32>
    %cst_58 = arith.constant dense<0.000000e+00> : vector<1xf32>
    %142 = vector.multi_reduction <add>, %141, %cst_58 [0] : vector<8x1xf32> to vector<1xf32>
    %143 = vector.shape_cast %142 : vector<1xf32> to vector<1x1xf32>
    %cst_59 = arith.constant 2.048000e+03 : f32
    %144 = vector.broadcast %cst_59 : f32 to vector<1x1xf32>
    %145 = arith.divf %143, %144 : vector<1x1xf32>
    %146 = vector.broadcast %145 : vector<1x1xf32> to vector<8x256xf32>
    %147 = arith.subf %139, %146 : vector<8x256xf32>
    %148 = arith.mulf %147, %147 : vector<8x256xf32>
    %cst_60 = arith.constant dense<0.000000e+00> : vector<8xf32>
    %149 = vector.multi_reduction <add>, %148, %cst_60 [1] : vector<8x256xf32> to vector<8xf32>
    %150 = vector.shape_cast %149 : vector<8xf32> to vector<8x1xf32>
    %cst_61 = arith.constant dense<0.000000e+00> : vector<1xf32>
    %151 = vector.multi_reduction <add>, %150, %cst_61 [0] : vector<8x1xf32> to vector<1xf32>
    %152 = vector.shape_cast %151 : vector<1xf32> to vector<1x1xf32>
    %cst_62 = arith.constant 2.048000e+03 : f32
    %153 = vector.broadcast %cst_62 : f32 to vector<1x1xf32>
    %154 = arith.divf %152, %153 : vector<1x1xf32>
    %cst_63 = arith.constant 9.99999974E-6 : f32
    %155 = vector.broadcast %cst_63 : f32 to vector<1x1xf32>
    %156 = arith.addf %154, %155 : vector<1x1xf32>
    %157 = math.rsqrt %156 : vector<1x1xf32>
    %158 = vector.broadcast %157 : vector<1x1xf32> to vector<8x256xf32>
    %159 = arith.mulf %147, %158 : vector<8x256xf32>
    %160 = tpu.concatenate %138, %159 in 1 : vector<8x256xf32>, vector<8x256xf32> -> vector<8x512xf32>
    %161 = tpu.concatenate %116, %160 in 0 : vector<8x512xf32>, vector<8x512xf32> -> vector<16x512xf32>
    %162 = vector.broadcast %1 : vector<16x1xf32> to vector<16x512xf32>
    %163 = arith.mulf %161, %162 : vector<16x512xf32>
    %164 = vector.broadcast %2 : vector<16x1xf32> to vector<16x512xf32>
    %165 = arith.addf %163, %164 : vector<16x512xf32>
    %cst_64 = arith.constant 0.000000e+00 : f32
    %166 = vector.broadcast %cst_64 : f32 to vector<16x512xf32>
    %167 = arith.maximumf %165, %166 : vector<16x512xf32>
    %168 = vector.extract_strided_slice %167 {offsets = [0, 0], sizes = [16, 256], strides = [1, 1]} : vector<16x512xf32> to vector<16x256xf32>
    %c17_i32_65 = arith.constant 17 : i32
    %169 = tpu.dynamic_rotate %168 by %c17_i32_65 dim 1 : vector<16x256xf32>, i32 -> vector<16x256xf32>
    %170 = vector.broadcast %6 : vector<1x256xf32> to vector<16x256xf32>
    %171 = arith.mulf %169, %170 : vector<16x256xf32>
    %c16_i32_66 = arith.constant 16 : i32
    %172 = tpu.dynamic_rotate %168 by %c16_i32_66 dim 1 : vector<16x256xf32>, i32 -> vector<16x256xf32>
    %173 = vector.broadcast %7 : vector<1x256xf32> to vector<16x256xf32>
    %174 = arith.mulf %172, %173 : vector<16x256xf32>
    %c15_i32_67 = arith.constant 15 : i32
    %175 = tpu.dynamic_rotate %168 by %c15_i32_67 dim 1 : vector<16x256xf32>, i32 -> vector<16x256xf32>
    %176 = vector.broadcast %8 : vector<1x256xf32> to vector<16x256xf32>
    %177 = arith.mulf %175, %176 : vector<16x256xf32>
    %c1_i32_68 = arith.constant 1 : i32
    %178 = tpu.dynamic_rotate %168 by %c1_i32_68 dim 1 : vector<16x256xf32>, i32 -> vector<16x256xf32>
    %179 = vector.broadcast %9 : vector<1x256xf32> to vector<16x256xf32>
    %180 = arith.mulf %178, %179 : vector<16x256xf32>
    %c255_i32_69 = arith.constant 255 : i32
    %181 = tpu.dynamic_rotate %168 by %c255_i32_69 dim 1 : vector<16x256xf32>, i32 -> vector<16x256xf32>
    %182 = vector.broadcast %10 : vector<1x256xf32> to vector<16x256xf32>
    %183 = arith.mulf %181, %182 : vector<16x256xf32>
    %c241_i32_70 = arith.constant 241 : i32
    %184 = tpu.dynamic_rotate %168 by %c241_i32_70 dim 1 : vector<16x256xf32>, i32 -> vector<16x256xf32>
    %185 = vector.broadcast %11 : vector<1x256xf32> to vector<16x256xf32>
    %186 = arith.mulf %184, %185 : vector<16x256xf32>
    %c240_i32_71 = arith.constant 240 : i32
    %187 = tpu.dynamic_rotate %168 by %c240_i32_71 dim 1 : vector<16x256xf32>, i32 -> vector<16x256xf32>
    %188 = vector.broadcast %12 : vector<1x256xf32> to vector<16x256xf32>
    %189 = arith.mulf %187, %188 : vector<16x256xf32>
    %c239_i32_72 = arith.constant 239 : i32
    %190 = tpu.dynamic_rotate %168 by %c239_i32_72 dim 1 : vector<16x256xf32>, i32 -> vector<16x256xf32>
    %191 = vector.broadcast %13 : vector<1x256xf32> to vector<16x256xf32>
    %192 = arith.mulf %190, %191 : vector<16x256xf32>
    %193 = tpu.concatenate %171, %174, %177, %180, %168, %183, %186, %189, %192 in 0 : vector<16x256xf32>, vector<16x256xf32>, vector<16x256xf32>, vector<16x256xf32>, vector<16x256xf32>, vector<16x256xf32>, vector<16x256xf32>, vector<16x256xf32>, vector<16x256xf32> -> vector<144x256xf32>
    %194 = vector.extract_strided_slice %167 {offsets = [0, 256], sizes = [16, 256], strides = [1, 1]} : vector<16x512xf32> to vector<16x256xf32>
    %c17_i32_73 = arith.constant 17 : i32
    %195 = tpu.dynamic_rotate %194 by %c17_i32_73 dim 1 : vector<16x256xf32>, i32 -> vector<16x256xf32>
    %196 = vector.broadcast %6 : vector<1x256xf32> to vector<16x256xf32>
    %197 = arith.mulf %195, %196 : vector<16x256xf32>
    %c16_i32_74 = arith.constant 16 : i32
    %198 = tpu.dynamic_rotate %194 by %c16_i32_74 dim 1 : vector<16x256xf32>, i32 -> vector<16x256xf32>
    %199 = vector.broadcast %7 : vector<1x256xf32> to vector<16x256xf32>
    %200 = arith.mulf %198, %199 : vector<16x256xf32>
    %c15_i32_75 = arith.constant 15 : i32
    %201 = tpu.dynamic_rotate %194 by %c15_i32_75 dim 1 : vector<16x256xf32>, i32 -> vector<16x256xf32>
    %202 = vector.broadcast %8 : vector<1x256xf32> to vector<16x256xf32>
    %203 = arith.mulf %201, %202 : vector<16x256xf32>
    %c1_i32_76 = arith.constant 1 : i32
    %204 = tpu.dynamic_rotate %194 by %c1_i32_76 dim 1 : vector<16x256xf32>, i32 -> vector<16x256xf32>
    %205 = vector.broadcast %9 : vector<1x256xf32> to vector<16x256xf32>
    %206 = arith.mulf %204, %205 : vector<16x256xf32>
    %c255_i32_77 = arith.constant 255 : i32
    %207 = tpu.dynamic_rotate %194 by %c255_i32_77 dim 1 : vector<16x256xf32>, i32 -> vector<16x256xf32>
    %208 = vector.broadcast %10 : vector<1x256xf32> to vector<16x256xf32>
    %209 = arith.mulf %207, %208 : vector<16x256xf32>
    %c241_i32_78 = arith.constant 241 : i32
    %210 = tpu.dynamic_rotate %194 by %c241_i32_78 dim 1 : vector<16x256xf32>, i32 -> vector<16x256xf32>
    %211 = vector.broadcast %11 : vector<1x256xf32> to vector<16x256xf32>
    %212 = arith.mulf %210, %211 : vector<16x256xf32>
    %c240_i32_79 = arith.constant 240 : i32
    %213 = tpu.dynamic_rotate %194 by %c240_i32_79 dim 1 : vector<16x256xf32>, i32 -> vector<16x256xf32>
    %214 = vector.broadcast %12 : vector<1x256xf32> to vector<16x256xf32>
    %215 = arith.mulf %213, %214 : vector<16x256xf32>
    %c239_i32_80 = arith.constant 239 : i32
    %216 = tpu.dynamic_rotate %194 by %c239_i32_80 dim 1 : vector<16x256xf32>, i32 -> vector<16x256xf32>
    %217 = vector.broadcast %13 : vector<1x256xf32> to vector<16x256xf32>
    %218 = arith.mulf %216, %217 : vector<16x256xf32>
    %219 = tpu.concatenate %197, %200, %203, %206, %194, %209, %212, %215, %218 in 0 : vector<16x256xf32>, vector<16x256xf32>, vector<16x256xf32>, vector<16x256xf32>, vector<16x256xf32>, vector<16x256xf32>, vector<16x256xf32>, vector<16x256xf32>, vector<16x256xf32> -> vector<144x256xf32>
    %220 = tpu.concatenate %193, %219 in 1 : vector<144x256xf32>, vector<144x256xf32> -> vector<144x512xf32>
    %c0_81 = arith.constant 0 : index
    %c0_82 = arith.constant 0 : index
    %221 = vector.load %arg3[%c0_81, %c0_82] : memref<16x144xf32, #tpu.memory_space<vmem>>, vector<16x144xf32>
    %cst_83 = arith.constant dense<0.000000e+00> : vector<16x512xf32>
    %222 = tpu.matmul %221, %220, %cst_83 {dimension_numbers = #tpu.dot_dimension_numbers<[1], [0], [0], [1], [0, 0, 1, 1], [], []>} : vector<16x144xf32>, vector<144x512xf32>, vector<16x512xf32> -> vector<16x512xf32>
    %223 = vector.broadcast %3 : vector<16x1xf32> to vector<16x512xf32>
    %224 = arith.addf %222, %223 : vector<16x512xf32>
    %225 = vector.extract_strided_slice %224 {offsets = [0, 0], sizes = [8, 512], strides = [1, 1]} : vector<16x512xf32> to vector<8x512xf32>
    %226 = vector.extract_strided_slice %225 {offsets = [0, 0], sizes = [8, 256], strides = [1, 1]} : vector<8x512xf32> to vector<8x256xf32>
    %cst_84 = arith.constant dense<0.000000e+00> : vector<8xf32>
    %227 = vector.multi_reduction <add>, %226, %cst_84 [1] : vector<8x256xf32> to vector<8xf32>
    %228 = vector.shape_cast %227 : vector<8xf32> to vector<8x1xf32>
    %cst_85 = arith.constant dense<0.000000e+00> : vector<1xf32>
    %229 = vector.multi_reduction <add>, %228, %cst_85 [0] : vector<8x1xf32> to vector<1xf32>
    %230 = vector.shape_cast %229 : vector<1xf32> to vector<1x1xf32>
    %cst_86 = arith.constant 2.048000e+03 : f32
    %231 = vector.broadcast %cst_86 : f32 to vector<1x1xf32>
    %232 = arith.divf %230, %231 : vector<1x1xf32>
    %233 = vector.broadcast %232 : vector<1x1xf32> to vector<8x256xf32>
    %234 = arith.subf %226, %233 : vector<8x256xf32>
    %235 = arith.mulf %234, %234 : vector<8x256xf32>
    %cst_87 = arith.constant dense<0.000000e+00> : vector<8xf32>
    %236 = vector.multi_reduction <add>, %235, %cst_87 [1] : vector<8x256xf32> to vector<8xf32>
    %237 = vector.shape_cast %236 : vector<8xf32> to vector<8x1xf32>
    %cst_88 = arith.constant dense<0.000000e+00> : vector<1xf32>
    %238 = vector.multi_reduction <add>, %237, %cst_88 [0] : vector<8x1xf32> to vector<1xf32>
    %239 = vector.shape_cast %238 : vector<1xf32> to vector<1x1xf32>
    %cst_89 = arith.constant 2.048000e+03 : f32
    %240 = vector.broadcast %cst_89 : f32 to vector<1x1xf32>
    %241 = arith.divf %239, %240 : vector<1x1xf32>
    %cst_90 = arith.constant 9.99999974E-6 : f32
    %242 = vector.broadcast %cst_90 : f32 to vector<1x1xf32>
    %243 = arith.addf %241, %242 : vector<1x1xf32>
    %244 = math.rsqrt %243 : vector<1x1xf32>
    %245 = vector.broadcast %244 : vector<1x1xf32> to vector<8x256xf32>
    %246 = arith.mulf %234, %245 : vector<8x256xf32>
    %247 = vector.extract_strided_slice %225 {offsets = [0, 256], sizes = [8, 256], strides = [1, 1]} : vector<8x512xf32> to vector<8x256xf32>
    %cst_91 = arith.constant dense<0.000000e+00> : vector<8xf32>
    %248 = vector.multi_reduction <add>, %247, %cst_91 [1] : vector<8x256xf32> to vector<8xf32>
    %249 = vector.shape_cast %248 : vector<8xf32> to vector<8x1xf32>
    %cst_92 = arith.constant dense<0.000000e+00> : vector<1xf32>
    %250 = vector.multi_reduction <add>, %249, %cst_92 [0] : vector<8x1xf32> to vector<1xf32>
    %251 = vector.shape_cast %250 : vector<1xf32> to vector<1x1xf32>
    %cst_93 = arith.constant 2.048000e+03 : f32
    %252 = vector.broadcast %cst_93 : f32 to vector<1x1xf32>
    %253 = arith.divf %251, %252 : vector<1x1xf32>
    %254 = vector.broadcast %253 : vector<1x1xf32> to vector<8x256xf32>
    %255 = arith.subf %247, %254 : vector<8x256xf32>
    %256 = arith.mulf %255, %255 : vector<8x256xf32>
    %cst_94 = arith.constant dense<0.000000e+00> : vector<8xf32>
    %257 = vector.multi_reduction <add>, %256, %cst_94 [1] : vector<8x256xf32> to vector<8xf32>
    %258 = vector.shape_cast %257 : vector<8xf32> to vector<8x1xf32>
    %cst_95 = arith.constant dense<0.000000e+00> : vector<1xf32>
    %259 = vector.multi_reduction <add>, %258, %cst_95 [0] : vector<8x1xf32> to vector<1xf32>
    %260 = vector.shape_cast %259 : vector<1xf32> to vector<1x1xf32>
    %cst_96 = arith.constant 2.048000e+03 : f32
    %261 = vector.broadcast %cst_96 : f32 to vector<1x1xf32>
    %262 = arith.divf %260, %261 : vector<1x1xf32>
    %cst_97 = arith.constant 9.99999974E-6 : f32
    %263 = vector.broadcast %cst_97 : f32 to vector<1x1xf32>
    %264 = arith.addf %262, %263 : vector<1x1xf32>
    %265 = math.rsqrt %264 : vector<1x1xf32>
    %266 = vector.broadcast %265 : vector<1x1xf32> to vector<8x256xf32>
    %267 = arith.mulf %255, %266 : vector<8x256xf32>
    %268 = tpu.concatenate %246, %267 in 1 : vector<8x256xf32>, vector<8x256xf32> -> vector<8x512xf32>
    %269 = vector.extract_strided_slice %224 {offsets = [8, 0], sizes = [8, 512], strides = [1, 1]} : vector<16x512xf32> to vector<8x512xf32>
    %270 = vector.extract_strided_slice %269 {offsets = [0, 0], sizes = [8, 256], strides = [1, 1]} : vector<8x512xf32> to vector<8x256xf32>
    %cst_98 = arith.constant dense<0.000000e+00> : vector<8xf32>
    %271 = vector.multi_reduction <add>, %270, %cst_98 [1] : vector<8x256xf32> to vector<8xf32>
    %272 = vector.shape_cast %271 : vector<8xf32> to vector<8x1xf32>
    %cst_99 = arith.constant dense<0.000000e+00> : vector<1xf32>
    %273 = vector.multi_reduction <add>, %272, %cst_99 [0] : vector<8x1xf32> to vector<1xf32>
    %274 = vector.shape_cast %273 : vector<1xf32> to vector<1x1xf32>
    %cst_100 = arith.constant 2.048000e+03 : f32
    %275 = vector.broadcast %cst_100 : f32 to vector<1x1xf32>
    %276 = arith.divf %274, %275 : vector<1x1xf32>
    %277 = vector.broadcast %276 : vector<1x1xf32> to vector<8x256xf32>
    %278 = arith.subf %270, %277 : vector<8x256xf32>
    %279 = arith.mulf %278, %278 : vector<8x256xf32>
    %cst_101 = arith.constant dense<0.000000e+00> : vector<8xf32>
    %280 = vector.multi_reduction <add>, %279, %cst_101 [1] : vector<8x256xf32> to vector<8xf32>
    %281 = vector.shape_cast %280 : vector<8xf32> to vector<8x1xf32>
    %cst_102 = arith.constant dense<0.000000e+00> : vector<1xf32>
    %282 = vector.multi_reduction <add>, %281, %cst_102 [0] : vector<8x1xf32> to vector<1xf32>
    %283 = vector.shape_cast %282 : vector<1xf32> to vector<1x1xf32>
    %cst_103 = arith.constant 2.048000e+03 : f32
    %284 = vector.broadcast %cst_103 : f32 to vector<1x1xf32>
    %285 = arith.divf %283, %284 : vector<1x1xf32>
    %cst_104 = arith.constant 9.99999974E-6 : f32
    %286 = vector.broadcast %cst_104 : f32 to vector<1x1xf32>
    %287 = arith.addf %285, %286 : vector<1x1xf32>
    %288 = math.rsqrt %287 : vector<1x1xf32>
    %289 = vector.broadcast %288 : vector<1x1xf32> to vector<8x256xf32>
    %290 = arith.mulf %278, %289 : vector<8x256xf32>
    %291 = vector.extract_strided_slice %269 {offsets = [0, 256], sizes = [8, 256], strides = [1, 1]} : vector<8x512xf32> to vector<8x256xf32>
    %cst_105 = arith.constant dense<0.000000e+00> : vector<8xf32>
    %292 = vector.multi_reduction <add>, %291, %cst_105 [1] : vector<8x256xf32> to vector<8xf32>
    %293 = vector.shape_cast %292 : vector<8xf32> to vector<8x1xf32>
    %cst_106 = arith.constant dense<0.000000e+00> : vector<1xf32>
    %294 = vector.multi_reduction <add>, %293, %cst_106 [0] : vector<8x1xf32> to vector<1xf32>
    %295 = vector.shape_cast %294 : vector<1xf32> to vector<1x1xf32>
    %cst_107 = arith.constant 2.048000e+03 : f32
    %296 = vector.broadcast %cst_107 : f32 to vector<1x1xf32>
    %297 = arith.divf %295, %296 : vector<1x1xf32>
    %298 = vector.broadcast %297 : vector<1x1xf32> to vector<8x256xf32>
    %299 = arith.subf %291, %298 : vector<8x256xf32>
    %300 = arith.mulf %299, %299 : vector<8x256xf32>
    %cst_108 = arith.constant dense<0.000000e+00> : vector<8xf32>
    %301 = vector.multi_reduction <add>, %300, %cst_108 [1] : vector<8x256xf32> to vector<8xf32>
    %302 = vector.shape_cast %301 : vector<8xf32> to vector<8x1xf32>
    %cst_109 = arith.constant dense<0.000000e+00> : vector<1xf32>
    %303 = vector.multi_reduction <add>, %302, %cst_109 [0] : vector<8x1xf32> to vector<1xf32>
    %304 = vector.shape_cast %303 : vector<1xf32> to vector<1x1xf32>
    %cst_110 = arith.constant 2.048000e+03 : f32
    %305 = vector.broadcast %cst_110 : f32 to vector<1x1xf32>
    %306 = arith.divf %304, %305 : vector<1x1xf32>
    %cst_111 = arith.constant 9.99999974E-6 : f32
    %307 = vector.broadcast %cst_111 : f32 to vector<1x1xf32>
    %308 = arith.addf %306, %307 : vector<1x1xf32>
    %309 = math.rsqrt %308 : vector<1x1xf32>
    %310 = vector.broadcast %309 : vector<1x1xf32> to vector<8x256xf32>
    %311 = arith.mulf %299, %310 : vector<8x256xf32>
    %312 = tpu.concatenate %290, %311 in 1 : vector<8x256xf32>, vector<8x256xf32> -> vector<8x512xf32>
    %313 = tpu.concatenate %268, %312 in 0 : vector<8x512xf32>, vector<8x512xf32> -> vector<16x512xf32>
    %314 = vector.broadcast %4 : vector<16x1xf32> to vector<16x512xf32>
    %315 = arith.mulf %313, %314 : vector<16x512xf32>
    %316 = vector.broadcast %5 : vector<16x1xf32> to vector<16x512xf32>
    %317 = arith.addf %315, %316 : vector<16x512xf32>
    %cst_112 = arith.constant 0.000000e+00 : f32
    %318 = vector.broadcast %cst_112 : f32 to vector<16x512xf32>
    %319 = arith.maximumf %317, %318 : vector<16x512xf32>
    %c0_113 = arith.constant 0 : index
    %c0_114 = arith.constant 0 : index
    %c0_115 = arith.constant 0 : index
    %320 = vector.load %arg1[%c0_113, %c0_114, %c0_115] : memref<2x16x256xf32, #tpu.memory_space<vmem>>, vector<1x16x256xf32>
    %321 = vector.shape_cast %320 : vector<1x16x256xf32> to vector<16x256xf32>
    %322 = vector.extract_strided_slice %319 {offsets = [0, 0], sizes = [16, 256], strides = [1, 1]} : vector<16x512xf32> to vector<16x256xf32>
    %323 = arith.addf %321, %322 : vector<16x256xf32>
    %cst_116 = arith.constant 0.000000e+00 : f32
    %324 = vector.broadcast %cst_116 : f32 to vector<16x256xf32>
    %325 = arith.maximumf %323, %324 : vector<16x256xf32>
    %c0_117 = arith.constant 0 : index
    %c0_118 = arith.constant 0 : index
    %c0_119 = arith.constant 0 : index
    %326 = vector.load %arg6[%c0_117, %c0_118, %c0_119] : memref<2x16x256xf32, #tpu.memory_space<vmem>>, vector<1x16x256xf32>
    %327 = vector.shape_cast %326 : vector<1x16x256xf32> to vector<16x256xf32>
    %328 = vector.shape_cast %325 : vector<16x256xf32> to vector<1x16x256xf32>
    tpu.vector_store %arg6[%c0_117, %c0_118, %c0_119], %328 {strides = array<i32>} : memref<2x16x256xf32, #tpu.memory_space<vmem>>, vector<1x16x256xf32>,
    %c1_120 = arith.constant 1 : index
    %c0_121 = arith.constant 0 : index
    %c0_122 = arith.constant 0 : index
    %329 = vector.load %arg1[%c1_120, %c0_121, %c0_122] : memref<2x16x256xf32, #tpu.memory_space<vmem>>, vector<1x16x256xf32>
    %330 = vector.shape_cast %329 : vector<1x16x256xf32> to vector<16x256xf32>
    %331 = vector.extract_strided_slice %319 {offsets = [0, 256], sizes = [16, 256], strides = [1, 1]} : vector<16x512xf32> to vector<16x256xf32>
    %332 = arith.addf %330, %331 : vector<16x256xf32>
    %cst_123 = arith.constant 0.000000e+00 : f32
    %333 = vector.broadcast %cst_123 : f32 to vector<16x256xf32>
    %334 = arith.maximumf %332, %333 : vector<16x256xf32>
    %c1_124 = arith.constant 1 : index
    %c0_125 = arith.constant 0 : index
    %c0_126 = arith.constant 0 : index
    %335 = vector.load %arg6[%c1_124, %c0_125, %c0_126] : memref<2x16x256xf32, #tpu.memory_space<vmem>>, vector<1x16x256xf32>
    %336 = vector.shape_cast %335 : vector<1x16x256xf32> to vector<16x256xf32>
    %337 = vector.shape_cast %334 : vector<16x256xf32> to vector<1x16x256xf32>
    tpu.vector_store %arg6[%c1_124, %c0_125, %c0_126], %337 {strides = array<i32>} : memref<2x16x256xf32, #tpu.memory_space<vmem>>, vector<1x16x256xf32>,
    return
  }
  func.func @transform_0(%arg0: i32) -> (i32, i32, i32) {
    %c0_i32 = arith.constant 0 : i32
    %c0_i32_0 = arith.constant 0 : i32
    %c0_i32_1 = arith.constant 0 : i32
    return %arg0, %c0_i32, %c0_i32_0 : i32, i32, i32
  }
  func.func @transform_1(%arg0: i32) -> (i32, i32) {
    %c0_i32 = arith.constant 0 : i32
    %c0_i32_0 = arith.constant 0 : i32
    %c0_i32_1 = arith.constant 0 : i32
    return %c0_i32, %c0_i32_0 : i32, i32
  }
  func.func @transform_2(%arg0: i32) -> (i32, i32) {
    %c0_i32 = arith.constant 0 : i32
    %c0_i32_0 = arith.constant 0 : i32
    %c0_i32_1 = arith.constant 0 : i32
    return %c0_i32, %c0_i32_0 : i32, i32
  }
  func.func @transform_3(%arg0: i32) -> (i32, i32) {
    %c0_i32 = arith.constant 0 : i32
    %c0_i32_0 = arith.constant 0 : i32
    %c0_i32_1 = arith.constant 0 : i32
    return %c0_i32, %c0_i32_0 : i32, i32
  }
  func.func @transform_4(%arg0: i32) -> (i32, i32) {
    %c0_i32 = arith.constant 0 : i32
    %c0_i32_0 = arith.constant 0 : i32
    %c0_i32_1 = arith.constant 0 : i32
    return %c0_i32, %c0_i32_0 : i32, i32
  }
  func.func @transform_5(%arg0: i32) -> (i32, i32, i32) {
    %c0_i32 = arith.constant 0 : i32
    %c0_i32_0 = arith.constant 0 : i32
    %c0_i32_1 = arith.constant 0 : i32
    return %arg0, %c0_i32, %c0_i32_0 : i32, i32, i32
  }
}

</mosaic_0001>

<bundles_post_ra>
// kernel: tpu_custom_call.1
= control target key start
LH: loop header
LB: loop body
LE: loop exit
PB: predicated region body
PF: predicated region fallthrough
CT: control target
= control target key end

     0   :  { %10 = vsyncpa [#allocation3], 0  ;;  %s3504_s0 = inlined_call_operand.hbm [shape: f32[4,16,256], index: 0, kind: input, shape index: {}]   ;;  %s3505_s1 = inlined_call_operand.hbm [shape: f32[16,144], index: 1, kind: input, shape index: {}]   ;;  %s3506_s2 = inlined_call_operand.hbm [shape: f32[16,144], index: 2, kind: input, shape index: {}]   ;;  %s3507_s3 = inlined_call_operand.vmem [shape: f32[16,6], index: 3, kind: input, shape index: {}]   ;;  %s3508_s4 = inlined_call_operand.vmem [shape: f32[8,256], index: 4, kind: input, shape index: {}]   ;;  %s3509_s5 = inlined_call_operand.hbm [shape: f32[4,16,256], index: 5, kind: output, shape index: {}]  }
   0x1   :  { %12 = vsyncpa [#allocation3 + $0x1], 0 }
   0x2   :  { %13 = vsyncpa [#allocation6], 0 }
   0x3   :  { %14 = vsyncpa [#allocation4], 0 }
   0x4   :  { %16 = vsyncpa [#allocation4 + $0x1], 0  ;;  %s2220_s18 = smov 0   ;;  %s2222_s19 = smov 0  }
   0x5   :  { %s2224_s20 = smov 0   ;;  %s2226_s21 = smov 0  }
   0x6 LB: > { %s2241_s22 = sadd.s32 4294967295, %s2167_s21   ;;  %s1699_s23 = sadd.s32 4294967294, %s2167_s21   ;;  %s2167_s21 = sphi %s2226_s21, %s3529_s21   ;;  %s2163_s20 = sphi %s2224_s20, %s3528_s20   ;;  %s2159_s19 = sphi %s2222_s19, %s3527_s19   ;;  %s2155_s18 = sphi %s2220_s18, %s3526_s18  }
   0x7   : > { %p42_p0 = scmp.ne.s32.totalorder %s2159_s19, %s2155_s18  ;;  %p3510_p1 = scmp.eq.s32.totalorder %s2241_s22, 0 }
   0x8   : > { %p156_p3 = scmp.eq.s32.totalorder %s1699_s23, 1  ;;  %p1700_p5 = scmp.ge.s32.totalorder %s2167_s21, 1 }
   0x9   : > { %p2250_p4 = por %p3510_p1, %p42_p0  ;;  %p163_p7 = scmp.lt.s32.totalorder %s2167_s21, 3 }
   0xa   : > { %p2255_p6 = por %p156_p3, %p42_p0  ;;  %s2169_s27 = smov [#allocation5]  }
   0xb   : > { %s3513_s24 = scalar_select %p2250_p4, 1, 0 }
   0xc   : > { %s3514_s25 = scalar_select %p2255_p6, 1, 0 }
   0xd   : > { %p2260_p8 = pnand %p1700_p5, %p163_p7  ;;  %s175_s28 = sshll.u32 %s2169_s27, 4  ;;  %s2264_s28 = int_to_ptr.vmem [resolvable:$true] %s175_s28 }
   0xe   : > { %s2170_s30 = smov [#allocation7]   ;;  %s2011_s9 = scalar_lea.hbm %s3505_s1, 512 }
   0xf   : > { %p1906_p9 = pneg %p2260_p8  ;;  %s188_s6 = sshll.u32 %s2170_s30, 4  ;;  %s2275_s6 = int_to_ptr.vmem [resolvable:$true] %s188_s6 }
  0x10   : > { %p2012_p12 = scmp.ne.s32.totalorder %s3505_s1, %s2011_s9  ;;  %p2018_p5 = scmp.lt.u32.totalorder %s2011_s9, %s3505_s1 }
  0x11   : > { %p2271_p11 = pnand %p1906_p9, %p3510_p1 }
  0x13   : > { %p2013_p13 = pneg %p2271_p11 }
  0x15   : > { %p2014_p0 = pnand %p2013_p13, %p2012_p12 }
  0x17   : > { %p2015_p3 = pneg %p2014_p0 }
  0x19   : > { %p2020_p7 = pnand %p2018_p5, %p2015_p3 }
  0x1b   : > { %2023 = shalt.err (!%p2020_p7)
}
  0x1c   : > { %s2024_s14 = scalar_lea.vmem %s2264_s28, 512  ;;  %p2032_p2 = scmp.lt.s32.totalorder %s2264_s28, %s2264_s28 }
  0x1d   : > { %p2025_p9 = scmp.ne.s32.totalorder %s2264_s28, %s2024_s14  ;;  %p2033_p12 = scmp.lt.s32.totalorder %s2024_s14, %s2024_s14 }
  0x1f   : > { %p2027_p10 = pnand %p2025_p9, %p2013_p13  ;;  %p2034_p0 = por %p2033_p12, %p2032_p2 }
  0x21   : > { %p2028_p1 = pneg %p2027_p10 }
  0x23   : > { %p2035_p6 = pnand %p2034_p0, %p2028_p1 }
  0x25   : > { %2038 = shalt.err (!%p2035_p6)
}
  0x26   : > { %s2171_s15 = smov 256   ;;  %s2172_s16 = smov 16  }
  0x27   : > { %1909 = dma.hbm_to_vmem [thread:$0]  (!%p2271_p11), %s3505_s1, 512, %s2264_s28, [#allocation6], %s2171_s15, %s2171_s15, %s2172_s16  }
  0x28   : > { %s2039_s7 = scalar_lea.hbm %s3506_s2, 512 }
  0x29   : > { %p2040_p1 = scmp.ne.s32.totalorder %s3506_s2, %s2039_s7  ;;  %p2046_p10 = scmp.lt.u32.totalorder %s2039_s7, %s3506_s2 }
  0x2b   : > { %p2042_p2 = pnand %p2040_p1, %p2013_p13 }
  0x2d   : > { %p2043_p6 = pneg %p2042_p2 }
  0x2f   : > { %p2048_p3 = pnand %p2046_p10, %p2043_p6 }
  0x31   : > { %2051 = shalt.err (!%p2048_p3)
}
  0x32   : > { %s2052_s28 = scalar_lea.vmem %s2275_s6, 512  ;;  %p2060_p12 = scmp.lt.s32.totalorder %s2275_s6, %s2275_s6 }
  0x33   : > { %p2053_p5 = scmp.ne.s32.totalorder %s2275_s6, %s2052_s28  ;;  %p2061_p0 = scmp.lt.s32.totalorder %s2052_s28, %s2052_s28 }
  0x35   : > { %p2055_p7 = pnand %p2053_p5, %p2013_p13  ;;  %p2062_p1 = por %p2061_p0, %p2060_p12 }
  0x37   : > { %p2056_p9 = pneg %p2055_p7 }
  0x39   : > { %p2063_p2 = pnand %p2062_p1, %p2056_p9 }
  0x3b   : > { %2066 = shalt.err (!%p2063_p2)
}
  0x3c   : > { %1912 = dma.hbm_to_vmem [thread:$0]  (!%p2271_p11), %s3506_s2, 512, %s2275_s6, [#allocation6], %s2171_s15, %s2171_s15, %s2172_s16  }
  0x3d   : > { %s2336_s29 = sadd.s32 1, %s2167_s21   ;;  %s29_s14 = sadd.s32 1, %s2163_s20 }
  0x3e   : > { %s26_s17 = ssub.s32 %s2167_s21, %s2336_s29  ;;  %p36_p13 = scmp.ne.s32.totalorder %s2163_s20, %s2159_s19 }
  0x3f   : > { %p27_p6 = scmp.eq.s32.totalorder %s26_s17, 0  ;;  %p37_p10 = scmp.eq.s32.totalorder %s2167_s21, 0 }
  0x40   : > { %p3517_p3 = scmp.eq.s32.totalorder %s2241_s22, 1  ;;  %p1923_p7 = scmp.lt.s32.totalorder %s2167_s21, 2 }
  0x41   : > { %s2352_s27 = scalar_select %p27_p6, %s2163_s20, %s29_s14  }
  0x42   : > { %p2346_p5 = por %p3517_p3, %p36_p13  ;;  %p38_p9 = por %p37_p10, %p36_p13 }
  0x43   : > { %s208_s30 = sand.u32 1, %s2163_s20   ;;  %s1747_s6 = sshll.u32 %s2167_s21, 10 }
  0x44   : > { %s3518_s23 = scalar_select %p2346_p5, 1, 0 }
  0x45   : > { %s1704_s7 = sshll.u32 %s208_s30, 6  ;;  %s2359_s10 = scalar_lea.hbm %s3504_s0, %s1747_s6 }
  0x46   : > { %s212_s11 = scalar_lea.vmem [#allocation2], %s1704_s7  ;;  %p2363_p11 = pnand %p1923_p7, %p38_p9 }
  0x47   : > { %s220_s28 = sshll.u32 %s212_s11, 4  ;;  %s2367_s13 = scalar_lea.sflag [#allocation3], %s208_s30  ;;  %s2361_s28 = int_to_ptr.vmem [resolvable:$true] %s220_s28 }
  0x48   : > { %s2067_s14 = scalar_lea.hbm %s2359_s10, 1024  ;;  %p2069_p0 = pneg %p2363_p11 }
  0x49   : > { %p2068_p12 = scmp.ne.s32.totalorder %s2359_s10, %s2067_s14  ;;  %s2072_s6 = scalar_lea.hbm %s3504_s0, 2048 }
  0x4a   : > { %p2073_p13 = scmp.lt.u32.totalorder %s2359_s10, %s3504_s0  ;;  %p2074_p6 = scmp.lt.u32.totalorder %s2072_s6, %s2067_s14 }
  0x4b   : > { %p2070_p1 = pnand %p2069_p0, %p2068_p12  ;;  %p2076_p3 = scmp.lt.u32.totalorder %s2067_s14, %s2359_s10 }
  0x4c   : > { %p2075_p10 = por %p2074_p6, %p2073_p13 }
  0x4d   : > { %p2071_p2 = pneg %p2070_p1 }
  0x4e   : > { %p2077_p7 = por %p2076_p3, %p2075_p10 }
  0x50   : > { %p2078_p9 = pnand %p2077_p7, %p2071_p2 }
  0x52   : > { %2081 = shalt.err (!%p2078_p9)
}
  0x53   : > { %s2082_s30 = scalar_lea.vmem %s2361_s28, 1024  ;;  %s2173_s11 = smov [#allocation2]  }
  0x54   : > { %p2083_p12 = scmp.ne.s32.totalorder %s2361_s28, %s2082_s30  ;;  %s2087_s17 = sshll.u32 %s2173_s11, 4  ;;  %s2088_s17 = int_to_ptr.vmem [resolvable:$false] %s2087_s17 }
  0x55   : > { %s2089_s7 = scalar_lea.vmem %s2088_s17, 2048  ;;  %p2090_p4 = scmp.lt.s32.totalorder %s2361_s28, %s2088_s17 }
  0x56   : > { %p2085_p1 = pnand %p2083_p12, %p2069_p0  ;;  %p2091_p13 = scmp.lt.s32.totalorder %s2089_s7, %s2082_s30 }
  0x58   : > { %p2086_p5 = pneg %p2085_p1  ;;  %p2092_p6 = por %p2091_p13, %p2090_p4 }
  0x5a   : > { %p2093_p10 = pnand %p2092_p6, %p2086_p5 }
  0x5c   : > { %2096 = shalt.err (!%p2093_p10)
}
  0x5d   : > { %1916 = dma.hbm_to_vmem [thread:$0]  (!%p2363_p11), %s2359_s10, 1024, %s2361_s28, %s2367_s13, %s2171_s15, %s2171_s15, %s2172_s16  }
  0x5e   : > { %232 = sbr.rel (%p2260_p8) target bundleno = 1739 (0x6cb), region = 40  ;;  %s2401_s14 = sand.u32 (!%p2260_p8), 1, %s2159_s19  }
  0x5f   : > { %s1709_s6 = sshll.u32 (!%p2260_p8), %s2401_s14, 6  ;;  %s235_s8 = scalar_lea.sflag (!%p2260_p8), [#allocation3], %s2401_s14 }
  0x60   : > { %s2407_s12 = scalar_lea.vmem (!%p2260_p8), [#allocation2], %s1709_s6  ;;  %p3520_p4 = scmp.ne.s32.totalorder (!%p2260_p8), %s3513_s24, 0 }
  0x65   : > { %2142 = dma.done.wait (%p3520_p4), %s235_s8, 1024  }
  0x66   : > { %2144 = vsyncadd (%p3520_p4), %s235_s8, 4294966272  ;;  %p3521_p5 = scmp.eq.s32.totalorder %s2241_s22, 0 }
  0x68   : > { %2146 = dma.done.wait (%p3521_p5), [#allocation6], 1024   ;;  %p3522_p8 = pmov %p3521_p5 }
  0x69   : > { %v2418_v0 = vld [vmem:[%s2407_s12 + $0x8] sm:$0xff]  ;;  %v2421_v1 = vld [vmem:[%s2407_s12] sm:$0xff]  ;;  %s2174_s24 = smov 17   ;;  %v2428_v2 = vld [vmem:[%s2407_s12 + $0x18] sm:$0xff]  ;;  %s2175_s26 = smov 16   ;;  %v304_v8 = vlaneseq  ;;  %vm669_vm0 = vcmask 130048  }
  0x6a   : > { %2148 = vsyncadd (%p3522_p8), [#allocation6], 4294966272  ;;  %300 = vrot.lane.b32.xlu1 %v2418_v0, %s2174_s24  ;;  %296 = vrot.lane.b32.xlu0 %v2421_v1, %s2174_s24  ;;  %v2431_v3 = vld [vmem:[%s2407_s12 + $0x10] sm:$0xff]  ;;  %v2441_v5 = vld [vmem:[%s2407_s12 + $0x20] sm:$0xff]  ;;  %s2176_s15 = smov 15   ;;  %s2177_s16 = smov 1  }
  0x6b   : > { %v2438_v4 = vld [vmem:[%s2407_s12 + $0x30] sm:$0xff]  ;;  %v2448_v6 = vld [vmem:[%s2407_s12 + $0x38] sm:$0xff]  ;;  %v2451_v7 = vld [vmem:[%s2407_s12 + $0x28] sm:$0xff]  ;;  %s2178_s10 = smov 127   ;;  %s2179_s28 = smov 113   ;;  %v313_v9 = vshrl.u32 %v304_v8, 7 }
  0x6c   : > { %s2180_s13 = smov 112   ;;  %v2553_v10 = vand.u32 127, %v304_v8  ;;  %v656_v12 = vld [vmem:[#allocation5 + $0x8] sm:$0xff]  ;;  %s2181_s9 = smov 111   ;;  %v2182_v33 = vmov 0   ;;  %v2602_v34 = vld [vmem:[%s3507_s3] sm:$0xff] }
  0x6d   : > { %v2555_v11 = vsub.s32 1, %v313_v9  ;;  %v277_v13 = vld [vmem:[%s3508_s4] ss:$8 sm:$0x3]  ;;  %v2564_v14 = vsub.s32 0, %v313_v9  ;;  %1724 = vmatprep.mubr.msk.f32.mxu0 %vm669_vm0, %v656_v12  ;;  %1726 = vmatprep.mubr.msk.f32.mxu1 %vm669_vm0, %v656_v12  ;;  %p3523_p0 = scmp.ne.s32.totalorder %s3518_s23, 0 }
  0x6e   : > { %302 = vrot.lane.b32.xlu1 %v2428_v2, %s2174_s24  ;;  %298 = vrot.lane.b32.xlu0 %v2431_v3, %s2174_s24  ;;  %vm306_vm1 = vcmp.lt.s32.totalorder %v2553_v10, 17  ;;  %v2607_v37 = vld [vmem:[%s3507_s3 + $0x8] sm:$0xff]  ;;  %vm334_vm2 = vcmp.lt.s32.totalorder %v2553_v10, 16  ;;  %vm362_vm3 = vcmp.lt.s32.totalorder %v2553_v10, 15  ;;  %vm390_vm4 = vcmp.lt.s32.totalorder %v2553_v10, 1  ;;  %s2188_s17 = smov [#allocation8]  }
  0x6f   : > { %v2570_v17 = vrot.slane %v277_v13, %v2555_v11  ;;  %v2579_v19 = vrot.slane %v277_v13, %v2564_v14  ;;  %1978 = vset.pattern.permute.xlu0 %v2182_v33  ;;  %1979 = vset.pattern.permute.xlu1 %v2182_v33  ;;  %v1713_v46 = vld [vmem:[%s3508_s4 + $0x1] ss:$8 sm:$0x3]  ;;  %vm418_vm5 = vcmp.lt.s32.totalorder %v2553_v10, 127  ;;  %vm446_vm6 = vcmp.lt.s32.totalorder %v2553_v10, 113  ;;  %s2101_s7 = sshll.u32 %s2188_s17, 4  ;;  %s2102_s7 = int_to_ptr.vmem [resolvable:$false] %s2101_s7 }
  0x70   : > { %v2628_v51 = vrot.slane %v1713_v46, %v2564_v14  ;;  %v2631_v52 = vrot.slane %v1713_v46, %v2555_v11  ;;  %vm474_vm7 = vcmp.lt.s32.totalorder %v2553_v10, 112  ;;  %vm502_vm8 = vcmp.lt.s32.totalorder %v2553_v10, 111  ;;  %v1239_v10 = vld [vmem:[#allocation7] sm:$0xff]  ;;  %s2103_s8 = scalar_lea.vmem %s2102_s7, 2048 }
  0x72   : > { %529 = vrot.lane.b32.xlu1 %v2438_v4, %s2174_s24  ;;  %527 = vrot.lane.b32.xlu0 %v2441_v5, %s2174_s24 }
  0x76   : > { %533 = vrot.lane.b32.xlu1 %v2448_v6, %s2174_s24  ;;  %531 = vrot.lane.b32.xlu0 %v2451_v7, %s2174_s24 }
  0x7a   : > { %328 = vrot.lane.b32.xlu1 %v2431_v3, %s2175_s26  ;;  %326 = vrot.lane.b32.xlu0 %v2421_v1, %s2175_s26 }
  0x7e   : > { %332 = vrot.lane.b32.xlu1 %v2428_v2, %s2175_s26  ;;  %330 = vrot.lane.b32.xlu0 %v2418_v0, %s2175_s26 }
  0x82   : > { %545 = vrot.lane.b32.xlu1 %v2438_v4, %s2175_s26  ;;  %543 = vrot.lane.b32.xlu0 %v2441_v5, %s2175_s26 }
  0x86   : > { %549 = vrot.lane.b32.xlu1 %v2448_v6, %s2175_s26  ;;  %547 = vrot.lane.b32.xlu0 %v2451_v7, %s2175_s26 }
  0x8a   : > { %356 = vrot.lane.b32.xlu1 %v2431_v3, %s2176_s15  ;;  %354 = vrot.lane.b32.xlu0 %v2421_v1, %s2176_s15 }
  0x8e   : > { %360 = vrot.lane.b32.xlu1 %v2428_v2, %s2176_s15  ;;  %358 = vrot.lane.b32.xlu0 %v2418_v0, %s2176_s15 }
  0x92   : > { %561 = vrot.lane.b32.xlu1 %v2438_v4, %s2176_s15  ;;  %559 = vrot.lane.b32.xlu0 %v2441_v5, %s2176_s15 }
  0x96   : > { %565 = vrot.lane.b32.xlu1 %v2448_v6, %s2176_s15  ;;  %563 = vrot.lane.b32.xlu0 %v2451_v7, %s2176_s15 }
  0x9a   : > { %384 = vrot.lane.b32.xlu1 %v2431_v3, %s2177_s16  ;;  %382 = vrot.lane.b32.xlu0 %v2421_v1, %s2177_s16 }
  0x9e   : > { %388 = vrot.lane.b32.xlu1 %v2428_v2, %s2177_s16  ;;  %386 = vrot.lane.b32.xlu0 %v2418_v0, %s2177_s16 }
  0xa2   : > { %577 = vrot.lane.b32.xlu1 %v2438_v4, %s2177_s16  ;;  %575 = vrot.lane.b32.xlu0 %v2441_v5, %s2177_s16 }
  0xa6   : > { %581 = vrot.lane.b32.xlu1 %v2448_v6, %s2177_s16  ;;  %579 = vrot.lane.b32.xlu0 %v2451_v7, %s2177_s16 }
  0xaa   : > { %412 = vrot.lane.b32.xlu1 %v2431_v3, %s2178_s10  ;;  %410 = vrot.lane.b32.xlu0 %v2421_v1, %s2178_s10 }
  0xae   : > { %416 = vrot.lane.b32.xlu1 %v2428_v2, %s2178_s10  ;;  %414 = vrot.lane.b32.xlu0 %v2418_v0, %s2178_s10 }
  0xb2   : > { %593 = vrot.lane.b32.xlu1 %v2438_v4, %s2178_s10  ;;  %591 = vrot.lane.b32.xlu0 %v2441_v5, %s2178_s10 }
  0xb6   : > { %597 = vrot.lane.b32.xlu1 %v2448_v6, %s2178_s10  ;;  %595 = vrot.lane.b32.xlu0 %v2451_v7, %s2178_s10 }
  0xba   : > { %440 = vrot.lane.b32.xlu1 %v2431_v3, %s2179_s28  ;;  %438 = vrot.lane.b32.xlu0 %v2421_v1, %s2179_s28 }
  0xbe   : > { %444 = vrot.lane.b32.xlu1 %v2428_v2, %s2179_s28  ;;  %442 = vrot.lane.b32.xlu0 %v2418_v0, %s2179_s28 }
  0xc2   : > { %609 = vrot.lane.b32.xlu1 %v2438_v4, %s2179_s28  ;;  %607 = vrot.lane.b32.xlu0 %v2441_v5, %s2179_s28 }
  0xc6   : > { %613 = vrot.lane.b32.xlu1 %v2448_v6, %s2179_s28  ;;  %611 = vrot.lane.b32.xlu0 %v2451_v7, %s2179_s28 }
  0xca   : > { %468 = vrot.lane.b32.xlu1 %v2431_v3, %s2180_s13  ;;  %466 = vrot.lane.b32.xlu0 %v2421_v1, %s2180_s13 }
  0xce   : > { %472 = vrot.lane.b32.xlu1 %v2428_v2, %s2180_s13  ;;  %470 = vrot.lane.b32.xlu0 %v2418_v0, %s2180_s13 }
  0xd2   : > { %625 = vrot.lane.b32.xlu1 %v2438_v4, %s2180_s13  ;;  %623 = vrot.lane.b32.xlu0 %v2441_v5, %s2180_s13 }
  0xd6   : > { %629 = vrot.lane.b32.xlu1 %v2448_v6, %s2180_s13  ;;  %627 = vrot.lane.b32.xlu0 %v2451_v7, %s2180_s13 }
  0xda   : > { %496 = vrot.lane.b32.xlu1 %v2431_v3, %s2181_s9  ;;  %494 = vrot.lane.b32.xlu0 %v2421_v1, %s2181_s9 }
  0xdc   : > { %v301_v15 = vpop.permute.xlu1 %300  ;;  %v297_v16 = vpop.permute.xlu0 %296 }
  0xdd   : > { %v307_v18 = vsel %vm306_vm1, %v297_v16, %v301_v15  ;;  %v309_v20 = vsel %vm306_vm1, %v301_v15, %v297_v16 }
  0xde   : > { %500 = vrot.lane.b32.xlu1 %v2428_v2, %s2181_s9  ;;  %498 = vrot.lane.b32.xlu0 %v2418_v0, %s2181_s9  ;;  %v323_v25 = vmul.f32 %v2570_v17, %v307_v18  ;;  %v322_v27 = vmul.f32 %v2579_v19, %v309_v20 }
  0xe0   : > { %v303_v21 = vpop.permute.xlu1 %302  ;;  %v299_v22 = vpop.permute.xlu0 %298 }
  0xe1   : > { %v310_v23 = vsel %vm306_vm1, %v303_v21, %v299_v22  ;;  %v308_v24 = vsel %vm306_vm1, %v299_v22, %v303_v21 }
  0xe2   : > { %641 = vrot.lane.b32.xlu1 %v2438_v4, %s2181_s9  ;;  %639 = vrot.lane.b32.xlu0 %v2441_v5, %s2181_s9  ;;  %v325_v26 = vmul.f32 %v2570_v17, %v308_v24  ;;  %v324_v28 = vmul.f32 %v2579_v19, %v310_v23 }
  0xe4   : > { %v530_v29 = vpop.permute.xlu1 %529  ;;  %v528_v30 = vpop.permute.xlu0 %527  ;;  %v1750_v31 = vpack.c.bf16 %v325_v26, %v323_v25  ;;  %v1752_v32 = vpack.c.bf16 %v324_v28, %v322_v27  ;;  %v1714_v26 = vld [vmem:[%s3508_s4 + $0x2] ss:$8 sm:$0x3] }
  0xe6   : > { %645 = vrot.lane.b32.xlu1 %v2448_v6, %s2181_s9  ;;  %643 = vrot.lane.b32.xlu0 %v2451_v7, %s2181_s9 }
  0xe7   : > { %1751 = vmatprep.subr.bf16.mxu0 %v1750_v31  ;;  %v2662_v31 = vrot.slane %v1714_v26, %v2564_v14 }
  0xe8   : > { %1753 = vmatpush1.bf16.msra.mxu0 %v1752_v32  ;;  %v534_v35 = vpop.permute.xlu1 %533  ;;  %v532_v36 = vpop.permute.xlu0 %531  ;;  %v2665_v32 = vrot.slane %v1714_v26, %v2555_v11 }
  0xe9   : > { %v538_v38 = vsel %vm306_vm1, %v534_v35, %v530_v29  ;;  %v537_v39 = vsel %vm306_vm1, %v532_v36, %v528_v30  ;;  %v535_v40 = vsel %vm306_vm1, %v528_v30, %v532_v36  ;;  %v536_v41 = vsel %vm306_vm1, %v530_v29, %v534_v35 }
  0xea   : > { %v540_v42 = vmul.f32 %v535_v40, %v2570_v17  ;;  %v542_v43 = vmul.f32 %v536_v41, %v2570_v17  ;;  %v539_v44 = vmul.f32 %v537_v39, %v2579_v19  ;;  %v541_v45 = vmul.f32 %v538_v38, %v2579_v19  ;;  %661 = vperm.xlu0 %1978, %v2602_v34  }
  0xeb   : > { %666 = vperm.xlu1 %1979, %v2607_v37  }
  0xec   : > { %v329_v47 = vpop.permute.xlu1 %328  ;;  %v327_v48 = vpop.permute.xlu0 %326  ;;  %v1786_v49 = vpack.c.bf16 %v542_v43, %v540_v42  ;;  %v1788_v50 = vpack.c.bf16 %v541_v45, %v539_v44 }
  0xee   : > { %1787 = vmatprep.subr.bf16.mxu1 %v1786_v49 }
  0xef   : > { %1789 = vmatpush1.bf16.msra.mxu1 %v1788_v50 }
  0xf0   : > { %v333_v53 = vpop.permute.xlu1 %332  ;;  %v331_v54 = vpop.permute.xlu0 %330 }
  0xf1   : > { %v336_v55 = vsel %vm334_vm2, %v329_v47, %v333_v53  ;;  %v338_v56 = vsel %vm334_vm2, %v333_v53, %v329_v47  ;;  %v335_v57 = vsel %vm334_vm2, %v327_v48, %v331_v54  ;;  %v337_v58 = vsel %vm334_vm2, %v331_v54, %v327_v48 }
  0xf2   : > { %v352_v59 = vmul.f32 %v2628_v51, %v338_v56  ;;  %v353_v60 = vmul.f32 %v2631_v52, %v336_v55  ;;  %v350_v61 = vmul.f32 %v2628_v51, %v337_v58  ;;  %v351_v62 = vmul.f32 %v2631_v52, %v335_v57 }
  0xf4   : > { %v546_v63 = vpop.permute.xlu1 %545  ;;  %v544_v8 = vpop.permute.xlu0 %543  ;;  %v1754_v9 = vpack.c.bf16 %v353_v60, %v351_v62  ;;  %v1756_v12 = vpack.c.bf16 %v352_v59, %v350_v61  ;;  %v1715_v61 = vld [vmem:[%s3508_s4 + $0x3] ss:$8 sm:$0x3] }
  0xf6   : > { %1755 = vmatprep.subr.bf16.mxu0 %v1754_v9 }
  0xf7   : > { %1757 = vmatpush1.bf16.msra.mxu0 %v1756_v12  ;;  %v2696_v12 = vrot.slane %v1715_v61, %v2564_v14 }
  0xf8   : > { %v550_v13 = vpop.permute.xlu1 %549  ;;  %v548_v15 = vpop.permute.xlu0 %547 }
  0xf9   : > { %v552_v16 = vsel %vm334_vm2, %v546_v63, %v550_v13  ;;  %v554_v18 = vsel %vm334_vm2, %v550_v13, %v546_v63  ;;  %v551_v20 = vsel %vm334_vm2, %v544_v8, %v548_v15  ;;  %v553_v21 = vsel %vm334_vm2, %v548_v15, %v544_v8 }
  0xfa   : > { %v557_v22 = vmul.f32 %v554_v18, %v2628_v51  ;;  %v558_v23 = vmul.f32 %v552_v16, %v2631_v52  ;;  %v555_v24 = vmul.f32 %v553_v21, %v2628_v51  ;;  %v556_v25 = vmul.f32 %v551_v20, %v2631_v52 }
  0xfb   : > { %v2699_v13 = vrot.slane %v1715_v61, %v2555_v11 }
  0xfc   : > { %v357_v27 = vpop.permute.xlu1 %356  ;;  %v355_v28 = vpop.permute.xlu0 %354  ;;  %v1790_v29 = vpack.c.bf16 %v558_v23, %v556_v25  ;;  %v1792_v30 = vpack.c.bf16 %v557_v22, %v555_v24 }
  0xfe   : > { %1791 = vmatprep.subr.bf16.mxu1 %v1790_v29 }
  0xff   : > { %1793 = vmatpush1.bf16.msra.mxu1 %v1792_v30 }
 0x100   : > { %v361_v33 = vpop.permute.xlu1 %360  ;;  %v359_v35 = vpop.permute.xlu0 %358 }
 0x101   : > { %v364_v36 = vsel %vm362_vm3, %v357_v27, %v361_v33  ;;  %v366_v38 = vsel %vm362_vm3, %v361_v33, %v357_v27  ;;  %v363_v39 = vsel %vm362_vm3, %v355_v28, %v359_v35  ;;  %v365_v40 = vsel %vm362_vm3, %v359_v35, %v355_v28 }
 0x102   : > { %v380_v41 = vmul.f32 %v2662_v31, %v366_v38  ;;  %v381_v42 = vmul.f32 %v2665_v32, %v364_v36  ;;  %v378_v43 = vmul.f32 %v2662_v31, %v365_v40  ;;  %v379_v44 = vmul.f32 %v2665_v32, %v363_v39 }
 0x103   : > { %v1766_v33 = vpack.c.bf16 %v2428_v2, %v2418_v0  ;;  %v1768_v35 = vpack.c.bf16 %v2431_v3, %v2421_v1 }
 0x104   : > { %v562_v45 = vpop.permute.xlu1 %561  ;;  %v560_v46 = vpop.permute.xlu0 %559  ;;  %v1758_v47 = vpack.c.bf16 %v381_v42, %v379_v44  ;;  %v1760_v48 = vpack.c.bf16 %v380_v41, %v378_v43  ;;  %v1716_v43 = vld [vmem:[%s3508_s4 + $0x4] ss:$8 sm:$0x3] }
 0x106   : > { %1759 = vmatprep.subr.bf16.mxu0 %v1758_v47 }
 0x107   : > { %1761 = vmatpush1.bf16.msra.mxu0 %v1760_v48  ;;  %v1802_v48 = vpack.c.bf16 %v2448_v6, %v2451_v7 }
 0x108   : > { %v566_v49 = vpop.permute.xlu1 %565  ;;  %v564_v50 = vpop.permute.xlu0 %563 }
 0x109   : > { %v568_v53 = vsel %vm362_vm3, %v562_v45, %v566_v49  ;;  %v570_v54 = vsel %vm362_vm3, %v566_v49, %v562_v45  ;;  %v567_v55 = vsel %vm362_vm3, %v560_v46, %v564_v50  ;;  %v569_v56 = vsel %vm362_vm3, %v564_v50, %v560_v46 }
 0x10a   : > { %v573_v57 = vmul.f32 %v570_v54, %v2662_v31  ;;  %v574_v58 = vmul.f32 %v568_v53, %v2665_v32  ;;  %v571_v59 = vmul.f32 %v569_v56, %v2662_v31  ;;  %v572_v60 = vmul.f32 %v567_v55, %v2665_v32 }
 0x10b   : > { %v2736_v49 = vrot.slane %v1716_v43, %v2564_v14  ;;  %v2739_v50 = vrot.slane %v1716_v43, %v2555_v11  ;;  %v1804_v53 = vpack.c.bf16 %v2438_v4, %v2441_v5 }
 0x10c   : > { %v385_v62 = vpop.permute.xlu1 %384  ;;  %v383_v63 = vpop.permute.xlu0 %382  ;;  %v1794_v8 = vpack.c.bf16 %v574_v58, %v572_v60  ;;  %v1796_v9 = vpack.c.bf16 %v573_v57, %v571_v59 }
 0x10e   : > { %1795 = vmatprep.subr.bf16.mxu1 %v1794_v8 }
 0x10f   : > { %1797 = vmatpush1.bf16.msra.mxu1 %v1796_v9 }
 0x110   : > { %v389_v15 = vpop.permute.xlu1 %388  ;;  %v387_v16 = vpop.permute.xlu0 %386 }
 0x111   : > { %v392_v18 = vsel %vm390_vm4, %v385_v62, %v389_v15  ;;  %v394_v20 = vsel %vm390_vm4, %v389_v15, %v385_v62  ;;  %v391_v21 = vsel %vm390_vm4, %v383_v63, %v387_v16  ;;  %v393_v22 = vsel %vm390_vm4, %v387_v16, %v383_v63 }
 0x112   : > { %v408_v23 = vmul.f32 %v2696_v12, %v394_v20  ;;  %v409_v24 = vmul.f32 %v2699_v13, %v392_v18  ;;  %v406_v25 = vmul.f32 %v2696_v12, %v393_v22  ;;  %v407_v26 = vmul.f32 %v2699_v13, %v391_v21 }
 0x114   : > { %v578_v27 = vpop.permute.xlu1 %577  ;;  %v576_v28 = vpop.permute.xlu0 %575  ;;  %v1762_v29 = vpack.c.bf16 %v409_v24, %v407_v26  ;;  %v1764_v30 = vpack.c.bf16 %v408_v23, %v406_v25  ;;  %v1717_v25 = vld [vmem:[%s3508_s4 + $0x5] ss:$8 sm:$0x3] }
 0x116   : > { %1763 = vmatprep.subr.bf16.mxu0 %v1762_v29 }
 0x117   : > { %1765 = vmatpush1.bf16.msra.mxu0 %v1764_v30  ;;  %v2772_v30 = vrot.slane %v1717_v25, %v2564_v14 }
 0x118   : > { %v582_v36 = vpop.permute.xlu1 %581  ;;  %v580_v38 = vpop.permute.xlu0 %579  ;;  %1767 = vmatprep.subr.bf16.mxu0 %v1766_v33  ;;  %v2775_v33 = vrot.slane %v1717_v25, %v2555_v11 }
 0x119   : > { %v584_v39 = vsel %vm390_vm4, %v578_v27, %v582_v36  ;;  %v586_v40 = vsel %vm390_vm4, %v582_v36, %v578_v27  ;;  %v583_v41 = vsel %vm390_vm4, %v576_v28, %v580_v38  ;;  %v585_v0 = vsel %vm390_vm4, %v580_v38, %v576_v28 }
 0x11a   : > { %v589_v2 = vmul.f32 %v586_v40, %v2696_v12  ;;  %v590_v42 = vmul.f32 %v584_v39, %v2699_v13  ;;  %v587_v1 = vmul.f32 %v585_v0, %v2696_v12  ;;  %v588_v3 = vmul.f32 %v583_v41, %v2699_v13 }
 0x11b   : > { %1769 = vmatpush1.bf16.msra.mxu0 %v1768_v35 }
 0x11c   : > { %v413_v44 = vpop.permute.xlu1 %412  ;;  %v411_v45 = vpop.permute.xlu0 %410  ;;  %v1798_v46 = vpack.c.bf16 %v590_v42, %v588_v3  ;;  %v1800_v47 = vpack.c.bf16 %v589_v2, %v587_v1 }
 0x11e   : > { %1799 = vmatprep.subr.bf16.mxu1 %v1798_v46 }
 0x11f   : > { %1801 = vmatpush1.bf16.msra.mxu1 %v1800_v47 }
 0x120   : > { %v417_v54 = vpop.permute.xlu1 %416  ;;  %v415_v55 = vpop.permute.xlu0 %414  ;;  %1803 = vmatprep.subr.bf16.mxu1 %v1802_v48 }
 0x121   : > { %v420_v56 = vsel %vm418_vm5, %v413_v44, %v417_v54  ;;  %v422_v6 = vsel %vm418_vm5, %v417_v54, %v413_v44  ;;  %v419_v7 = vsel %vm418_vm5, %v411_v45, %v415_v55  ;;  %v421_v57 = vsel %vm418_vm5, %v415_v55, %v411_v45 }
 0x122   : > { %v436_v58 = vmul.f32 %v2736_v49, %v420_v56  ;;  %v437_v59 = vmul.f32 %v2739_v50, %v422_v6  ;;  %v434_v4 = vmul.f32 %v2736_v49, %v419_v7  ;;  %v435_v5 = vmul.f32 %v2739_v50, %v421_v57 }
 0x123   : > { %1805 = vmatpush1.bf16.msra.mxu1 %v1804_v53 }
 0x124   : > { %v594_v60 = vpop.permute.xlu1 %593  ;;  %v592_v61 = vpop.permute.xlu0 %591  ;;  %v1770_v62 = vpack.c.bf16 %v437_v59, %v435_v5  ;;  %v1772_v63 = vpack.c.bf16 %v436_v58, %v434_v4  ;;  %v1718_v58 = vld [vmem:[%s3508_s4 + $0x6] ss:$8 sm:$0x3] }
 0x126   : > { %1771 = vmatprep.subr.bf16.mxu0 %v1770_v62  ;;  %v2809_v62 = vrot.slane %v1718_v58, %v2555_v11 }
 0x127   : > { %1773 = vmatpush1.bf16.msra.mxu0 %v1772_v63 }
 0x128   : > { %v598_v8 = vpop.permute.xlu1 %597  ;;  %v596_v9 = vpop.permute.xlu0 %595 }
 0x129   : > { %v600_v15 = vsel %vm418_vm5, %v594_v60, %v598_v8  ;;  %v602_v16 = vsel %vm418_vm5, %v598_v8, %v594_v60  ;;  %v599_v18 = vsel %vm418_vm5, %v592_v61, %v596_v9  ;;  %v601_v20 = vsel %vm418_vm5, %v596_v9, %v592_v61 }
 0x12a   : > { %v605_v21 = vmul.f32 %v600_v15, %v2736_v49  ;;  %v606_v22 = vmul.f32 %v602_v16, %v2739_v50  ;;  %v603_v23 = vmul.f32 %v599_v18, %v2736_v49  ;;  %v604_v24 = vmul.f32 %v601_v20, %v2739_v50 }
 0x12b   : > { %v2806_v61 = vrot.slane %v1718_v58, %v2564_v14 }
 0x12c   : > { %v441_v26 = vpop.permute.xlu1 %440  ;;  %v439_v27 = vpop.permute.xlu0 %438  ;;  %v1806_v28 = vpack.c.bf16 %v606_v22, %v604_v24  ;;  %v1808_v29 = vpack.c.bf16 %v605_v21, %v603_v23 }
 0x12e   : > { %1807 = vmatprep.subr.bf16.mxu1 %v1806_v28 }
 0x12f   : > { %1809 = vmatpush1.bf16.msra.mxu1 %v1808_v29 }
 0x130   : > { %v445_v35 = vpop.permute.xlu1 %444  ;;  %v443_v36 = vpop.permute.xlu0 %442 }
 0x131   : > { %v448_v38 = vsel %vm446_vm6, %v441_v26, %v445_v35  ;;  %v450_v39 = vsel %vm446_vm6, %v445_v35, %v441_v26  ;;  %v447_v40 = vsel %vm446_vm6, %v439_v27, %v443_v36  ;;  %v449_v41 = vsel %vm446_vm6, %v443_v36, %v439_v27 }
 0x132   : > { %v464_v0 = vmul.f32 %v2772_v30, %v448_v38  ;;  %v465_v2 = vmul.f32 %v2775_v33, %v450_v39  ;;  %v462_v42 = vmul.f32 %v2772_v30, %v447_v40  ;;  %v463_v1 = vmul.f32 %v2775_v33, %v449_v41 }
 0x134   : > { %v610_v3 = vpop.permute.xlu1 %609  ;;  %v608_v43 = vpop.permute.xlu0 %607  ;;  %v1774_v44 = vpack.c.bf16 %v465_v2, %v463_v1  ;;  %v1776_v45 = vpack.c.bf16 %v464_v0, %v462_v42  ;;  %v1719_v42 = vld [vmem:[%s3508_s4 + $0x7] ss:$8 sm:$0x3] }
 0x136   : > { %1775 = vmatprep.subr.bf16.mxu0 %v1774_v44 }
 0x137   : > { %1777 = vmatpush1.bf16.msra.mxu0 %v1776_v45  ;;  %v2840_v45 = vrot.slane %v1719_v42, %v2564_v14 }
 0x138   : > { %v614_v46 = vpop.permute.xlu1 %613  ;;  %v612_v47 = vpop.permute.xlu0 %611 }
 0x139   : > { %v616_v48 = vsel %vm446_vm6, %v610_v3, %v614_v46  ;;  %v618_v53 = vsel %vm446_vm6, %v614_v46, %v610_v3  ;;  %v615_v54 = vsel %vm446_vm6, %v608_v43, %v612_v47  ;;  %v617_v55 = vsel %vm446_vm6, %v612_v47, %v608_v43 }
 0x13a   : > { %v621_v56 = vmul.f32 %v616_v48, %v2772_v30  ;;  %v622_v6 = vmul.f32 %v618_v53, %v2775_v33  ;;  %v619_v7 = vmul.f32 %v615_v54, %v2772_v30  ;;  %v620_v57 = vmul.f32 %v617_v55, %v2775_v33 }
 0x13b   : > { %v2843_v46 = vrot.slane %v1719_v42, %v2555_v11 }
 0x13c   : > { %v469_v59 = vpop.permute.xlu1 %468  ;;  %v467_v4 = vpop.permute.xlu0 %466  ;;  %v1810_v5 = vpack.c.bf16 %v622_v6, %v620_v57  ;;  %v1812_v60 = vpack.c.bf16 %v621_v56, %v619_v7 }
 0x13e   : > { %1811 = vmatprep.subr.bf16.mxu1 %v1810_v5  ;;  %v655_v5 = vld [vmem:[#allocation5] sm:$0xff] }
 0x13f   : > { %1813 = vmatpush1.bf16.msra.mxu1 %v1812_v60 }
 0x140   : > { %v473_v63 = vpop.permute.xlu1 %472  ;;  %v471_v8 = vpop.permute.xlu0 %470 }
 0x141   : > { %v476_v9 = vsel %vm474_vm7, %v469_v59, %v473_v63  ;;  %v478_v15 = vsel %vm474_vm7, %v473_v63, %v469_v59  ;;  %v475_v16 = vsel %vm474_vm7, %v467_v4, %v471_v8  ;;  %v477_v18 = vsel %vm474_vm7, %v471_v8, %v467_v4  ;;  %v658_v8 = vld [vmem:[#allocation5 + $0x18] sm:$0xff] }
 0x142   : > { %v492_v20 = vmul.f32 %v2806_v61, %v476_v9  ;;  %v493_v21 = vmul.f32 %v2809_v62, %v478_v15  ;;  %v490_v22 = vmul.f32 %v2806_v61, %v475_v16  ;;  %v491_v23 = vmul.f32 %v2809_v62, %v477_v18 }
 0x144   : > { %v626_v24 = vpop.permute.xlu1 %625  ;;  %v624_v25 = vpop.permute.xlu0 %623  ;;  %v1778_v26 = vpack.c.bf16 %v493_v21, %v491_v23  ;;  %v1780_v27 = vpack.c.bf16 %v492_v20, %v490_v22 }
 0x146   : > { %1779 = vmatprep.subr.bf16.mxu0 %v1778_v26 }
 0x147   : > { %1781 = vmatpush1.bf16.msra.mxu0 %v1780_v27  ;;  %v2183_v27 = vmov 1  }
 0x148   : > { %v630_v28 = vpop.permute.xlu1 %629  ;;  %v628_v29 = vpop.permute.xlu0 %627  ;;  %1981 = vset.pattern.permute.xlu1 %v2183_v27  ;;  %1980 = vset.pattern.permute.xlu0 %v2183_v27 }
 0x149   : > { %v632_v35 = vsel %vm474_vm7, %v626_v24, %v630_v28  ;;  %v634_v36 = vsel %vm474_vm7, %v630_v28, %v626_v24  ;;  %v631_v38 = vsel %vm474_vm7, %v624_v25, %v628_v29  ;;  %v633_v39 = vsel %vm474_vm7, %v628_v29, %v624_v25  ;;  %v657_v24 = vld [vmem:[#allocation5 + $0x10] sm:$0xff] }
 0x14a   : > { %v637_v40 = vmul.f32 %v632_v35, %v2806_v61  ;;  %v638_v41 = vmul.f32 %v634_v36, %v2809_v62  ;;  %v635_v0 = vmul.f32 %v631_v38, %v2806_v61  ;;  %v636_v2 = vmul.f32 %v633_v39, %v2809_v62 }
 0x14c   : > { %v497_v1 = vpop.permute.xlu1 %496  ;;  %v495_v3 = vpop.permute.xlu0 %494  ;;  %v1814_v43 = vpack.c.bf16 %v638_v41, %v636_v2  ;;  %v1816_v44 = vpack.c.bf16 %v637_v40, %v635_v0 }
 0x14e   : > { %1815 = vmatprep.subr.bf16.mxu1 %v1814_v43 }
 0x14f   : > { %1817 = vmatpush1.bf16.msra.mxu1 %v1816_v44 }
 0x150   : > { %v501_v47 = vpop.permute.xlu1 %500  ;;  %v499_v48 = vpop.permute.xlu0 %498 }
 0x151   : > { %v504_v53 = vsel %vm502_vm8, %v497_v1, %v501_v47  ;;  %v506_v54 = vsel %vm502_vm8, %v501_v47, %v497_v1  ;;  %v503_v55 = vsel %vm502_vm8, %v495_v3, %v499_v48  ;;  %v505_v56 = vsel %vm502_vm8, %v499_v48, %v495_v3 }
 0x152   : > { %v520_v14 = vmul.f32 %v2840_v45, %v504_v53  ;;  %v521_v11 = vmul.f32 %v2843_v46, %v506_v54  ;;  %v518_v6 = vmul.f32 %v2840_v45, %v503_v55  ;;  %v519_v7 = vmul.f32 %v2843_v46, %v505_v56 }
 0x154   : > { %v642_v57 = vpop.permute.xlu1 %641  ;;  %v640_v58 = vpop.permute.xlu0 %639  ;;  %v1782_v59 = vpack.c.bf16 %v521_v11, %v519_v7  ;;  %v1784_v4 = vpack.c.bf16 %v520_v14, %v518_v6  ;;  %v2184_v11 = vmov 2  }
 0x156   : > { %1783 = vmatprep.subr.bf16.mxu0 %v1782_v59 }
 0x157   : > { %1785 = vmatpush1.bf16.msra.mxu0 %v1784_v4 }
 0x158   : > { %v646_v60 = vpop.permute.xlu1 %645  ;;  %v644_v63 = vpop.permute.xlu0 %643 }
 0x159   : > { %v648_v9 = vsel %vm502_vm8, %v642_v57, %v646_v60  ;;  %v650_v15 = vsel %vm502_vm8, %v646_v60, %v642_v57  ;;  %v647_v16 = vsel %vm502_vm8, %v640_v58, %v644_v63  ;;  %v649_v18 = vsel %vm502_vm8, %v644_v63, %v640_v58 }
 0x15a   : > { %v653_v20 = vmul.f32 %v648_v9, %v2840_v45  ;;  %v654_v21 = vmul.f32 %v650_v15, %v2843_v46  ;;  %v651_v22 = vmul.f32 %v647_v16, %v2840_v45  ;;  %v652_v23 = vmul.f32 %v649_v18, %v2843_v46  ;;  %741 = vmatmul.mubr.f32.vlgmr.msra.gmra.mrb[0].mxu0 %v655_v5 }
 0x15b   : > { %1725 = vmatprep.mubr.msk.f32.mxu0 %vm669_vm0, %v658_v8 }
 0x15c   : > { %v1818_v25 = vpack.c.bf16 %v654_v21, %v652_v23  ;;  %v1820_v26 = vpack.c.bf16 %v653_v20, %v651_v22 }
 0x15e   : > { %1819 = vmatprep.subr.bf16.mxu1 %v1818_v25  ;;  %747 = vmatmul.mubr.f32.gmra.mrb[2].mxu0 %v657_v24 }
 0x15f   : > { %1821 = vmatpush1.bf16.msra.mxu1 %v1820_v26 }
 0x162   : > { %818 = vmatmul.mubr.f32.vlgmr.msra.gmra.mrb[0].mxu1 %v655_v5 }
 0x163   : > { %1727 = vmatprep.mubr.msk.f32.mxu1 %vm669_vm0, %v658_v8 }
 0x166   : > { %824 = vmatmul.mubr.f32.gmra.mrb[2].mxu1 %v657_v24 }
 0x169   : > { %v662_v28 = vpop.permute.xlu0 %661 }
 0x16a   : > { %v667_v0 = vpop.permute.xlu1 %666 }
 0x22d   : > { %v742_v29 = vpop.f32.mrb[0].mxu0 }
 0x22e   : > { %v744_v35 = vpop.f32.mrb[1].mxu0  ;;  %v743_v36 = vadd.f32 %v742_v29, %v662_v28 }
 0x22f   : > { %v745_v38 = vadd.f32 %v744_v35, %v662_v28 }
 0x231   : > { %v830_v39 = vadd.f32 %v745_v38, %v743_v36  ;;  %v748_v40 = vpop.f32.mrb[2].mxu0 }
 0x232   : > { %v750_v41 = vpop.f32.mrb[3].mxu0  ;;  %v749_v43 = vadd.f32 %v748_v40, %v667_v0 }
 0x233   : > { %831 = vadd.xlane.f32.xlu1 %v830_v39  ;;  %v751_v44 = vadd.f32 %v750_v41, %v667_v0 }
 0x235   : > { %v819_v2 = vpop.f32.mrb[0].mxu1  ;;  %v887_v55 = vadd.f32 %v751_v44, %v749_v43 }
 0x236   : > { %v820_v42 = vadd.f32 %v819_v2, %v662_v28  ;;  %v821_v1 = vpop.f32.mrb[1].mxu1 }
 0x237   : > { %v822_v3 = vadd.f32 %v821_v1, %v662_v28 }
 0x239   : > { %v825_v47 = vpop.f32.mrb[2].mxu1  ;;  %v859_v48 = vadd.f32 %v822_v3, %v820_v42 }
 0x23a   : > { %v827_v53 = vpop.f32.mrb[3].mxu1  ;;  %v826_v54 = vadd.f32 %v825_v47, %v667_v0 }
 0x23b   : > { %860 = vadd.xlane.f32.xlu0 %v859_v48  ;;  %v828_v56 = vadd.f32 %v827_v53, %v667_v0 }
 0x23d   : > { %v915_v14 = vadd.f32 %v828_v56, %v826_v54 }
 0x23f   : > { %888 = vadd.xlane.f32.xlu0 %v887_v55  ;;  %916 = vadd.xlane.f32.xlu1 %v915_v14 }
 0x250   : > { %948 = vperm.xlu1 %1981, %v2607_v37  }
 0x254   : > { %1982 = vset.pattern.permute.xlu1 %v2184_v11 }
 0x255   : > { %960 = vperm.xlu1 %1982, %v2602_v34   ;;  %944 = vperm.xlu0 %1980, %v2602_v34  }
 0x259   : > { %964 = vperm.xlu1 %1982, %v2607_v37  }
 0x2c0   : > { %v832_v6 = vpop.xlane.xlu1 %831 }
 0x2c1   : > { %v833_v7 = vrot.slane %v832_v6, 4 }
 0x2c3   : > { %v834_v57 = vadd.f32 %v833_v7, %v832_v6 }
 0x2c5   : > { %v835_v58 = vrot.slane %v834_v57, 2 }
 0x2c7   : > { %v836_v59 = vadd.f32 %v835_v58, %v834_v57 }
 0x2c8   : > { %v861_v4 = vpop.xlane.xlu0 %860 }
 0x2c9   : > { %v837_v5 = vrot.slane %v836_v59, 1  ;;  %v862_v60 = vrot.slane %v861_v4, 4 }
 0x2cb   : > { %v838_v63 = vadd.f32 %v837_v5, %v836_v59  ;;  %v863_v8 = vadd.f32 %v862_v60, %v861_v4 }
 0x2cc   : > { %v889_v9 = vpop.xlane.xlu0 %888  ;;  %v917_v15 = vpop.xlane.xlu1 %916 }
 0x2cd   : > { %v840_v16 = vmul.f32 0.00048828125, %v838_v63  ;;  %v864_v18 = vrot.slane %v863_v8, 2  ;;  %v890_v20 = vrot.slane %v889_v9, 4  ;;  %v918_v21 = vrot.slane %v917_v15, 4 }
 0x2cf   : > { %v865_v22 = vadd.f32 %v864_v18, %v863_v8  ;;  %v891_v34 = vadd.f32 %v890_v20, %v889_v9  ;;  %v919_v23 = vadd.f32 %v918_v21, %v917_v15  ;;  %v2875_v37 = vsub.f32 %v743_v36, %v840_v16 }
 0x2d0   : > { %v2877_v24 = vsub.f32 %v745_v38, %v840_v16 }
 0x2d1   : > { %v866_v25 = vrot.slane %v865_v22, 1  ;;  %v892_v26 = vrot.slane %v891_v34, 2  ;;  %v920_v27 = vrot.slane %v919_v23, 2  ;;  %v843_v28 = vmul.f32 %v2875_v37, %v2875_v37 }
 0x2d2   : > { %v844_v29 = vmul.f32 %v2877_v24, %v2877_v24 }
 0x2d3   : > { %v867_v35 = vadd.f32 %v866_v25, %v865_v22  ;;  %v893_v39 = vadd.f32 %v892_v26, %v891_v34  ;;  %v921_v40 = vadd.f32 %v920_v27, %v919_v23 }
 0x2d4   : > { %v845_v41 = vadd.f32 %v844_v29, %v843_v28 }
 0x2d5   : > { %v868_v0 = vmul.f32 0.00048828125, %v867_v35  ;;  %v894_v2 = vrot.slane %v893_v39, 1  ;;  %v922_v1 = vrot.slane %v921_v40, 1 }
 0x2d6   : > { %846 = vadd.xlane.f32.xlu0 %v845_v41 }
 0x2d7   : > { %v895_v36 = vadd.f32 %v894_v2, %v893_v39  ;;  %v923_v38 = vadd.f32 %v922_v1, %v921_v40  ;;  %v2883_v47 = vsub.f32 %v820_v42, %v868_v0  ;;  %v2885_v48 = vsub.f32 %v822_v3, %v868_v0 }
 0x2d9   : > { %v896_v53 = vmul.f32 0.00048828125, %v895_v36  ;;  %v924_v55 = vmul.f32 0.00048828125, %v923_v38  ;;  %v871_v14 = vmul.f32 %v2883_v47, %v2883_v47  ;;  %v872_v11 = vmul.f32 %v2885_v48, %v2885_v48 }
 0x2db   : > { %v873_v6 = vadd.f32 %v872_v11, %v871_v14  ;;  %v2891_v7 = vsub.f32 %v749_v43, %v896_v53  ;;  %v2893_v57 = vsub.f32 %v751_v44, %v896_v53  ;;  %v2895_v58 = vsub.f32 %v826_v54, %v924_v55  ;;  %v2907_v54 = vpop.permute.xlu1 %948 }
 0x2dc   : > { %v2897_v59 = vsub.f32 %v828_v56, %v924_v55  ;;  %v945_v56 = vpop.permute.xlu0 %944 }
 0x2dd   : > { %874 = vadd.xlane.f32.xlu1 %v873_v6  ;;  %v899_v42 = vmul.f32 %v2891_v7, %v2891_v7  ;;  %v900_v3 = vmul.f32 %v2893_v57, %v2893_v57  ;;  %v927_v4 = vmul.f32 %v2895_v58, %v2895_v58 }
 0x2de   : > { %v928_v43 = vmul.f32 %v2897_v59, %v2897_v59 }
 0x2df   : > { %v901_v5 = vadd.f32 %v900_v3, %v899_v42  ;;  %v2909_v60 = vpop.permute.xlu1 %960 }
 0x2e0   : > { %v929_v44 = vadd.f32 %v928_v43, %v927_v4 }
 0x2e1   : > { %902 = vadd.xlane.f32.xlu0 %v901_v5 }
 0x2e2   : > { %930 = vadd.xlane.f32.xlu1 %v929_v44 }
 0x2e3   : > { %v2911_v9 = vpop.permute.xlu1 %964 }
 0x363   : > { %v847_v63 = vpop.xlane.xlu0 %846 }
 0x364   : > { %v848_v8 = vrot.slane %v847_v63, 4 }
 0x366   : > { %v849_v15 = vadd.f32 %v848_v8, %v847_v63 }
 0x368   : > { %v850_v16 = vrot.slane %v849_v15, 2 }
 0x36a   : > { %v851_v18 = vadd.f32 %v850_v16, %v849_v15  ;;  %v875_v20 = vpop.xlane.xlu1 %874 }
 0x36b   : > { %v876_v21 = vrot.slane %v875_v20, 4 }
 0x36c   : > { %v852_v22 = vrot.slane %v851_v18, 1 }
 0x36d   : > { %v877_v34 = vadd.f32 %v876_v21, %v875_v20 }
 0x36e   : > { %v853_v23 = vadd.f32 %v852_v22, %v851_v18  ;;  %v903_v25 = vpop.xlane.xlu0 %902 }
 0x36f   : > { %v878_v26 = vrot.slane %v877_v34, 2  ;;  %v904_v27 = vrot.slane %v903_v25, 4  ;;  %v931_v28 = vpop.xlane.xlu1 %930 }
 0x370   : > { %v854_v29 = vmul.f32 0.00048828125, %v853_v23  ;;  %v932_v35 = vrot.slane %v931_v28, 4 }
 0x371   : > { %v879_v39 = vadd.f32 %v878_v26, %v877_v34  ;;  %v905_v40 = vadd.f32 %v904_v27, %v903_v25 }
 0x372   : > { %v855_v41 = vadd.f32 1e-05, %v854_v29  ;;  %v933_v0 = vadd.f32 %v932_v35, %v931_v28 }
 0x373   : > { %v880_v2 = vrot.slane %v879_v39, 1  ;;  %v906_v1 = vrot.slane %v905_v40, 2 }
 0x374   : > { %1989 = vrsqrt.f32 %v855_v41  ;;  %v934_v36 = vrot.slane %v933_v0, 2 }
 0x375   : > { %v881_v38 = vadd.f32 %v880_v2, %v879_v39  ;;  %v907_v53 = vadd.f32 %v906_v1, %v905_v40 }
 0x376   : > { %v935_v55 = vadd.f32 %v934_v36, %v933_v0 }
 0x377   : > { %v882_v14 = vmul.f32 0.00048828125, %v881_v38  ;;  %v908_v11 = vrot.slane %v907_v53, 1 }
 0x378   : > { %v936_v6 = vrot.slane %v935_v55, 1 }
 0x379   : > { %v883_v42 = vadd.f32 1e-05, %v882_v14  ;;  %v909_v3 = vadd.f32 %v908_v11, %v907_v53 }
 0x37a   : > { %v937_v4 = vadd.f32 %v936_v6, %v935_v55 }
 0x37b   : > { %1991 = vrsqrt.f32 %v883_v42  ;;  %v910_v43 = vmul.f32 0.00048828125, %v909_v3  ;;  %v1240_v3 = vld [vmem:[#allocation7 + $0x8] sm:$0xff] }
 0x37c   : > { %v938_v5 = vmul.f32 0.00048828125, %v937_v4  ;;  %1728 = vmatprep.mubr.msk.f32.mxu0 %vm669_vm0, %v1240_v3  ;;  %1730 = vmatprep.mubr.msk.f32.mxu1 %vm669_vm0, %v1240_v3 }
 0x37d   : > { %v911_v44 = vadd.f32 1e-05, %v910_v43 }
 0x37e   : > { %v1990_v63 = vpop.eup %1989  ;;  %v939_v8 = vadd.f32 1e-05, %v938_v5 }
 0x37f   : > { %v857_v15 = vmul.f32 %v1990_v63, %v2875_v37  ;;  %v858_v16 = vmul.f32 %v1990_v63, %v2877_v24  ;;  %1993 = vrsqrt.f32 %v911_v44 }
 0x380   : > { %1995 = vrsqrt.f32 %v939_v8 }
 0x381   : > { %v951_v18 = vmul.f32 %v945_v56, %v857_v15  ;;  %v952_v20 = vmul.f32 %v945_v56, %v858_v16 }
 0x383   : > { %v967_v21 = vadd.f32 %v2909_v60, %v951_v18  ;;  %v968_v34 = vadd.f32 %v2909_v60, %v952_v20 }
 0x385   : > { %v1992_v22 = vpop.eup %1991  ;;  %v2917_v23 = vmax.f32 %v967_v21, 0.0  ;;  %v2923_v27 = vmax.f32 %v968_v34, 0.0  ;;  %v2185_v34 = vmov 3  }
 0x386   : > { %v885_v25 = vmul.f32 %v1992_v22, %v2883_v47  ;;  %v886_v26 = vmul.f32 %v1992_v22, %v2885_v48  ;;  %1983 = vset.pattern.permute.xlu1 %v2185_v34  ;;  %1984 = vset.pattern.permute.xlu0 %v2185_v34 }
 0x387   : > { %983 = vrot.lane.b32.xlu1 %v2917_v23, %s2174_s24 }
 0x388   : > { %v953_v37 = vmul.f32 %v945_v56, %v885_v25  ;;  %v954_v28 = vmul.f32 %v945_v56, %v886_v26 }
 0x389   : > { %v1994_v24 = vpop.eup %1993 }
 0x38a   : > { %v1996_v29 = vpop.eup %1995  ;;  %v969_v35 = vadd.f32 %v2909_v60, %v953_v37  ;;  %v970_v48 = vadd.f32 %v2909_v60, %v954_v28  ;;  %v913_v41 = vmul.f32 %v1994_v24, %v2891_v7  ;;  %v3102_v28 = vld [vmem:[%s3507_s3 + $0x8] sm:$0xff] }
 0x38b   : > { %v941_v39 = vmul.f32 %v1996_v29, %v2895_v58  ;;  %v942_v40 = vmul.f32 %v1996_v29, %v2897_v59  ;;  %987 = vrot.lane.b32.xlu1 %v2923_v27, %s2174_s24  ;;  %v914_v58 = vmul.f32 %v1994_v24, %v2893_v57 }
 0x38c   : > { %v2930_v47 = vmax.f32 %v969_v35, 0.0  ;;  %v2940_v59 = vmax.f32 %v970_v48, 0.0  ;;  %v955_v1 = vmul.f32 %v2907_v54, %v913_v41 }
 0x38d   : > { %v957_v0 = vmul.f32 %v2907_v54, %v941_v39  ;;  %v958_v56 = vmul.f32 %v2907_v54, %v942_v40  ;;  %v956_v7 = vmul.f32 %v2907_v54, %v914_v58  ;;  %v3112_v39 = vld [vmem:[%s3507_s3] sm:$0xff] }
 0x38e   : > { %v971_v38 = vadd.f32 %v2911_v9, %v955_v1 }
 0x38f   : > { %v973_v2 = vadd.f32 %v2911_v9, %v957_v0  ;;  %1111 = vrot.lane.b32.xlu1 %v2930_v47, %s2174_s24  ;;  %v974_v36 = vadd.f32 %v2911_v9, %v958_v56  ;;  %v972_v57 = vadd.f32 %v2911_v9, %v956_v7 }
 0x390   : > { %v2959_v55 = vmax.f32 %v971_v38, 0.0 }
 0x391   : > { %v2944_v60 = vmax.f32 %v973_v2, 0.0  ;;  %v2952_v53 = vmax.f32 %v974_v36, 0.0  ;;  %v2965_v54 = vmax.f32 %v972_v57, 0.0 }
 0x393   : > { %1115 = vrot.lane.b32.xlu1 %v2940_v59, %s2174_s24  ;;  %1113 = vrot.lane.b32.xlu0 %v2944_v60, %s2174_s24 }
 0x397   : > { %999 = vrot.lane.b32.xlu1 %v2917_v23, %s2175_s26  ;;  %1117 = vrot.lane.b32.xlu0 %v2952_v53, %s2174_s24 }
 0x39b   : > { %1003 = vrot.lane.b32.xlu1 %v2923_v27, %s2175_s26  ;;  %1001 = vrot.lane.b32.xlu0 %v2959_v55, %s2175_s26 }
 0x39f   : > { %1127 = vrot.lane.b32.xlu1 %v2930_v47, %s2175_s26  ;;  %1005 = vrot.lane.b32.xlu0 %v2965_v54, %s2175_s26 }
 0x3a3   : > { %1131 = vrot.lane.b32.xlu1 %v2940_v59, %s2175_s26  ;;  %1129 = vrot.lane.b32.xlu0 %v2944_v60, %s2175_s26 }
 0x3a7   : > { %1015 = vrot.lane.b32.xlu1 %v2917_v23, %s2176_s15  ;;  %1133 = vrot.lane.b32.xlu0 %v2952_v53, %s2175_s26 }
 0x3ab   : > { %1019 = vrot.lane.b32.xlu1 %v2923_v27, %s2176_s15  ;;  %1017 = vrot.lane.b32.xlu0 %v2959_v55, %s2176_s15 }
 0x3af   : > { %1143 = vrot.lane.b32.xlu1 %v2930_v47, %s2176_s15  ;;  %1021 = vrot.lane.b32.xlu0 %v2965_v54, %s2176_s15 }
 0x3b3   : > { %1147 = vrot.lane.b32.xlu1 %v2940_v59, %s2176_s15  ;;  %1145 = vrot.lane.b32.xlu0 %v2944_v60, %s2176_s15 }
 0x3b7   : > { %1031 = vrot.lane.b32.xlu1 %v2917_v23, %s2177_s16  ;;  %1149 = vrot.lane.b32.xlu0 %v2952_v53, %s2176_s15 }
 0x3bb   : > { %1035 = vrot.lane.b32.xlu1 %v2923_v27, %s2177_s16  ;;  %1033 = vrot.lane.b32.xlu0 %v2959_v55, %s2177_s16 }
 0x3bf   : > { %1159 = vrot.lane.b32.xlu1 %v2930_v47, %s2177_s16  ;;  %1037 = vrot.lane.b32.xlu0 %v2965_v54, %s2177_s16 }
 0x3c3   : > { %1163 = vrot.lane.b32.xlu1 %v2940_v59, %s2177_s16  ;;  %1161 = vrot.lane.b32.xlu0 %v2944_v60, %s2177_s16 }
 0x3c7   : > { %1047 = vrot.lane.b32.xlu1 %v2917_v23, %s2178_s10  ;;  %1165 = vrot.lane.b32.xlu0 %v2952_v53, %s2177_s16 }
 0x3cb   : > { %1051 = vrot.lane.b32.xlu1 %v2923_v27, %s2178_s10  ;;  %1049 = vrot.lane.b32.xlu0 %v2959_v55, %s2178_s10 }
 0x3cf   : > { %1175 = vrot.lane.b32.xlu1 %v2930_v47, %s2178_s10  ;;  %1053 = vrot.lane.b32.xlu0 %v2965_v54, %s2178_s10 }
 0x3d3   : > { %1179 = vrot.lane.b32.xlu1 %v2940_v59, %s2178_s10  ;;  %1177 = vrot.lane.b32.xlu0 %v2944_v60, %s2178_s10 }
 0x3d7   : > { %1063 = vrot.lane.b32.xlu1 %v2917_v23, %s2179_s28  ;;  %1181 = vrot.lane.b32.xlu0 %v2952_v53, %s2178_s10 }
 0x3db   : > { %1067 = vrot.lane.b32.xlu1 %v2923_v27, %s2179_s28  ;;  %1065 = vrot.lane.b32.xlu0 %v2959_v55, %s2179_s28 }
 0x3df   : > { %1191 = vrot.lane.b32.xlu1 %v2930_v47, %s2179_s28  ;;  %1069 = vrot.lane.b32.xlu0 %v2965_v54, %s2179_s28 }
 0x3e3   : > { %1195 = vrot.lane.b32.xlu1 %v2940_v59, %s2179_s28  ;;  %1193 = vrot.lane.b32.xlu0 %v2944_v60, %s2179_s28 }
 0x3e7   : > { %985 = vrot.lane.b32.xlu1 %v2959_v55, %s2174_s24  ;;  %1197 = vrot.lane.b32.xlu0 %v2952_v53, %s2179_s28  ;;  %s1749_s28 = sshll.u32 %s2241_s22, 10 }
 0x3e8   : > { %s3457_s22 = scalar_lea.hbm %s3509_s5, %s1749_s28 }
 0x3eb   : > { %989 = vrot.lane.b32.xlu1 %v2965_v54, %s2174_s24  ;;  %1081 = vrot.lane.b32.xlu0 %v2959_v55, %s2180_s13 }
 0x3ef   : > { %1079 = vrot.lane.b32.xlu1 %v2917_v23, %s2180_s13  ;;  %1085 = vrot.lane.b32.xlu0 %v2965_v54, %s2180_s13 }
 0x3f3   : > { %1083 = vrot.lane.b32.xlu1 %v2923_v27, %s2180_s13  ;;  %1209 = vrot.lane.b32.xlu0 %v2944_v60, %s2180_s13 }
 0x3f7   : > { %1207 = vrot.lane.b32.xlu1 %v2930_v47, %s2180_s13  ;;  %1213 = vrot.lane.b32.xlu0 %v2952_v53, %s2180_s13 }
 0x3f9   : > { %v984_v9 = vpop.permute.xlu1 %983 }
 0x3fb   : > { %1211 = vrot.lane.b32.xlu1 %v2940_v59, %s2180_s13  ;;  %1097 = vrot.lane.b32.xlu0 %v2959_v55, %s2181_s9  ;;  %s272_s13 = scalar_lea.vmem [#allocation8], %s1709_s6  ;;  %s1593_s6 = scalar_lea.sflag [#allocation4], %s2401_s14 }
 0x3fd   : > { %v988_v14 = vpop.permute.xlu1 %987 }
 0x3fe   : > { %v3065_v11 = vsel %vm306_vm1, %v984_v9, %v988_v14  ;;  %v3069_v6 = vsel %vm306_vm1, %v988_v14, %v984_v9 }
 0x3ff   : > { %1095 = vrot.lane.b32.xlu1 %v2917_v23, %s2181_s9  ;;  %1101 = vrot.lane.b32.xlu0 %v2965_v54, %s2181_s9 }
 0x401   : > { %v1112_v42 = vpop.permute.xlu1 %1111 }
 0x403   : > { %1099 = vrot.lane.b32.xlu1 %v2923_v27, %s2181_s9  ;;  %1225 = vrot.lane.b32.xlu0 %v2944_v60, %s2181_s9 }
 0x405   : > { %v1114_v4 = vpop.permute.xlu0 %1113  ;;  %v1116_v43 = vpop.permute.xlu1 %1115 }
 0x406   : > { %v1121_v5 = vsel %vm306_vm1, %v1116_v43, %v1112_v42  ;;  %v1119_v44 = vsel %vm306_vm1, %v1112_v42, %v1116_v43 }
 0x407   : > { %1223 = vrot.lane.b32.xlu1 %v2930_v47, %s2181_s9  ;;  %1229 = vrot.lane.b32.xlu0 %v2952_v53, %s2181_s9  ;;  %v1123_v15 = vmul.f32 %v1121_v5, %v2579_v19  ;;  %v1124_v20 = vmul.f32 %v1119_v44, %v2570_v17 }
 0x409   : > { %v1118_v63 = vpop.permute.xlu0 %1117  ;;  %v1000_v8 = vpop.permute.xlu1 %999 }
 0x40a   : > { %v1120_v16 = vsel %vm306_vm1, %v1114_v4, %v1118_v63  ;;  %v1122_v18 = vsel %vm306_vm1, %v1118_v63, %v1114_v4 }
 0x40b   : > { %v1125_v21 = vmul.f32 %v1122_v18, %v2579_v19  ;;  %v1126_v22 = vmul.f32 %v1120_v16, %v2570_v17  ;;  %1227 = vrot.lane.b32.xlu1 %v2940_v59, %s2181_s9  ;;  %1248 = vperm.xlu0 %1984, %v3102_v28   ;;  %s1607_s9 = sshll.u32 %s272_s13, 4  ;;  %s3459_s9 = int_to_ptr.vmem [resolvable:$true] %s1607_s9 }
 0x40c   : > { %p2104_p7 = scmp.lt.s32.totalorder %s3459_s9, %s2102_s7 }
 0x40d   : > { %v1860_v25 = vpack.c.bf16 %v1125_v21, %v1123_v15  ;;  %v1002_v26 = vpop.permute.xlu0 %1001  ;;  %v1004_v37 = vpop.permute.xlu1 %1003  ;;  %v1858_v24 = vpack.c.bf16 %v1126_v22, %v1124_v20 }
 0x40e   : > { %v1007_v29 = vsel %vm334_vm2, %v1000_v8, %v1004_v37  ;;  %v1009_v35 = vsel %vm334_vm2, %v1004_v37, %v1000_v8 }
 0x40f   : > { %1859 = vmatprep.subr.bf16.mxu1 %v1858_v24  ;;  %1244 = vperm.xlu1 %1983, %v3112_v39   ;;  %v3120_v56 = vmul.f32 %v1009_v35, %v2628_v51  ;;  %v3123_v2 = vmul.f32 %v1007_v29, %v2631_v52 }
 0x410   : > { %1861 = vmatpush1.bf16.msra.mxu1 %v1860_v25 }
 0x411   : > { %v1006_v40 = vpop.permute.xlu0 %1005  ;;  %v1128_v48 = vpop.permute.xlu1 %1127 }
 0x412   : > { %v1008_v41 = vsel %vm334_vm2, %v1002_v26, %v1006_v40  ;;  %v1010_v0 = vsel %vm334_vm2, %v1006_v40, %v1002_v26 }
 0x413   : > { %v3126_v58 = vmul.f32 %v1010_v0, %v2628_v51  ;;  %v3129_v1 = vmul.f32 %v1008_v41, %v2631_v52 }
 0x415   : > { %v1828_v36 = vpack.c.bf16 %v3126_v58, %v3120_v56  ;;  %v1130_v7 = vpop.permute.xlu0 %1129  ;;  %v1132_v38 = vpop.permute.xlu1 %1131  ;;  %v1826_v57 = vpack.c.bf16 %v3129_v1, %v3123_v2 }
 0x416   : > { %v1135_v9 = vsel %vm334_vm2, %v1128_v48, %v1132_v38  ;;  %v1137_v14 = vsel %vm334_vm2, %v1132_v38, %v1128_v48 }
 0x417   : > { %v1139_v5 = vmul.f32 %v1137_v14, %v2628_v51  ;;  %v1140_v44 = vmul.f32 %v1135_v9, %v2631_v52 }
 0x419   : > { %v1134_v42 = vpop.permute.xlu0 %1133  ;;  %v1016_v3 = vpop.permute.xlu1 %1015 }
 0x41a   : > { %v1136_v4 = vsel %vm334_vm2, %v1130_v7, %v1134_v42  ;;  %v1138_v43 = vsel %vm334_vm2, %v1134_v42, %v1130_v7 }
 0x41b   : > { %v1141_v63 = vmul.f32 %v1138_v43, %v2628_v51  ;;  %v1142_v8 = vmul.f32 %v1136_v4, %v2631_v52 }
 0x41d   : > { %v1864_v15 = vpack.c.bf16 %v1141_v63, %v1139_v5  ;;  %v1018_v16 = vpop.permute.xlu0 %1017  ;;  %v1020_v18 = vpop.permute.xlu1 %1019  ;;  %v1862_v20 = vpack.c.bf16 %v1142_v8, %v1140_v44 }
 0x41e   : > { %v1023_v21 = vsel %vm362_vm3, %v1016_v3, %v1020_v18  ;;  %v1025_v22 = vsel %vm362_vm3, %v1020_v18, %v1016_v3 }
 0x41f   : > { %1863 = vmatprep.subr.bf16.mxu1 %v1862_v20  ;;  %v3156_v52 = vmul.f32 %v1025_v22, %v2662_v31  ;;  %v3159_v37 = vmul.f32 %v1023_v21, %v2665_v32 }
 0x420   : > { %1865 = vmatpush1.bf16.msra.mxu1 %v1864_v15 }
 0x421   : > { %v1022_v34 = vpop.permute.xlu0 %1021  ;;  %v1144_v25 = vpop.permute.xlu1 %1143 }
 0x422   : > { %v1024_v26 = vsel %vm362_vm3, %v1018_v16, %v1022_v34  ;;  %v1026_v51 = vsel %vm362_vm3, %v1022_v34, %v1018_v16 }
 0x423   : > { %v3162_v24 = vmul.f32 %v1026_v51, %v2662_v31  ;;  %v3165_v29 = vmul.f32 %v1024_v26, %v2665_v32 }
 0x425   : > { %v1832_v35 = vpack.c.bf16 %v3162_v24, %v3156_v52  ;;  %v1146_v40 = vpop.permute.xlu0 %1145  ;;  %v1148_v48 = vpop.permute.xlu1 %1147  ;;  %v1830_v41 = vpack.c.bf16 %v3165_v29, %v3159_v37  ;;  %v1838_v29 = vpack.c.bf16 %v2965_v54, %v2923_v27 }
 0x426   : > { %v1151_v0 = vsel %vm362_vm3, %v1144_v25, %v1148_v48  ;;  %v1153_v7 = vsel %vm362_vm3, %v1148_v48, %v1144_v25 }
 0x427   : > { %v1155_v3 = vmul.f32 %v1153_v7, %v2662_v31  ;;  %v1156_v4 = vmul.f32 %v1151_v0, %v2665_v32 }
 0x429   : > { %v1150_v38 = vpop.permute.xlu0 %1149  ;;  %v3175_v9 = vpop.permute.xlu1 %1031 }
 0x42a   : > { %v1152_v14 = vsel %vm362_vm3, %v1146_v40, %v1150_v38  ;;  %v1154_v42 = vsel %vm362_vm3, %v1150_v38, %v1146_v40 }
 0x42b   : > { %v1157_v43 = vmul.f32 %v1154_v42, %v2662_v31  ;;  %v1158_v5 = vmul.f32 %v1152_v14, %v2665_v32 }
 0x42d   : > { %v1868_v44 = vpack.c.bf16 %v1157_v43, %v1155_v3  ;;  %v3185_v63 = vpop.permute.xlu0 %1033  ;;  %v3187_v8 = vpop.permute.xlu1 %1035  ;;  %v1866_v15 = vpack.c.bf16 %v1158_v5, %v1156_v4  ;;  %v1874_v3 = vpack.c.bf16 %v2952_v53, %v2940_v59  ;;  %v1876_v5 = vpack.c.bf16 %v2944_v60, %v2930_v47 }
 0x42f   : > { %1867 = vmatprep.subr.bf16.mxu1 %v1866_v15 }
 0x430   : > { %1869 = vmatpush1.bf16.msra.mxu1 %v1868_v44 }
 0x431   : > { %v3189_v16 = vpop.permute.xlu0 %1037  ;;  %v1160_v18 = vpop.permute.xlu1 %1159 }
 0x435   : > { %v1162_v20 = vpop.permute.xlu0 %1161  ;;  %v1164_v21 = vpop.permute.xlu1 %1163 }
 0x436   : > { %v1167_v22 = vsel %vm390_vm4, %v1160_v18, %v1164_v21  ;;  %v1169_v31 = vsel %vm390_vm4, %v1164_v21, %v1160_v18 }
 0x437   : > { %v1171_v51 = vmul.f32 %v1169_v31, %v2696_v12  ;;  %v1172_v40 = vmul.f32 %v1167_v22, %v2699_v13 }
 0x439   : > { %v1166_v32 = vpop.permute.xlu0 %1165  ;;  %v3195_v34 = vpop.permute.xlu1 %1047 }
 0x43a   : > { %v1168_v25 = vsel %vm390_vm4, %v1162_v20, %v1166_v32  ;;  %v1170_v26 = vsel %vm390_vm4, %v1166_v32, %v1162_v20 }
 0x43b   : > { %v1173_v48 = vmul.f32 %v1170_v26, %v2696_v12  ;;  %v1174_v0 = vmul.f32 %v1168_v25, %v2699_v13 }
 0x43d   : > { %v1872_v7 = vpack.c.bf16 %v1173_v48, %v1171_v51  ;;  %v3205_v38 = vpop.permute.xlu0 %1049  ;;  %v3207_v14 = vpop.permute.xlu1 %1051  ;;  %v1870_v42 = vpack.c.bf16 %v1174_v0, %v1172_v40 }
 0x43f   : > { %1871 = vmatprep.subr.bf16.mxu1 %v1870_v42 }
 0x440   : > { %1873 = vmatpush1.bf16.msra.mxu1 %v1872_v7 }
 0x441   : > { %v3211_v4 = vpop.permute.xlu0 %1053  ;;  %1875 = vmatprep.subr.bf16.mxu1 %v1874_v3  ;;  %v1176_v43 = vpop.permute.xlu1 %1175 }
 0x444   : > { %1877 = vmatpush1.bf16.msra.mxu1 %v1876_v5 }
 0x445   : > { %v1178_v44 = vpop.permute.xlu0 %1177  ;;  %v1180_v15 = vpop.permute.xlu1 %1179 }
 0x446   : > { %v1183_v18 = vsel %vm418_vm5, %v1176_v43, %v1180_v15  ;;  %v1185_v20 = vsel %vm418_vm5, %v1180_v15, %v1176_v43 }
 0x447   : > { %v1187_v47 = vmul.f32 %v1183_v18, %v2736_v49  ;;  %v1188_v60 = vmul.f32 %v1185_v20, %v2739_v50 }
 0x449   : > { %v1182_v21 = vpop.permute.xlu0 %1181  ;;  %v3219_v22 = vpop.permute.xlu1 %1063 }
 0x44a   : > { %v1184_v59 = vsel %vm418_vm5, %v1178_v44, %v1182_v21  ;;  %v1186_v53 = vsel %vm418_vm5, %v1182_v21, %v1178_v44 }
 0x44b   : > { %v1189_v31 = vmul.f32 %v1184_v59, %v2736_v49  ;;  %v1190_v32 = vmul.f32 %v1186_v53, %v2739_v50 }
 0x44d   : > { %v1880_v25 = vpack.c.bf16 %v1189_v31, %v1187_v47  ;;  %v3229_v26 = vpop.permute.xlu0 %1065  ;;  %v3231_v51 = vpop.permute.xlu1 %1067  ;;  %v1878_v40 = vpack.c.bf16 %v1190_v32, %v1188_v60 }
 0x44f   : > { %1879 = vmatprep.subr.bf16.mxu1 %v1878_v40 }
 0x450   : > { %1881 = vmatpush1.bf16.msra.mxu1 %v1880_v25 }
 0x451   : > { %v3233_v48 = vpop.permute.xlu0 %1069  ;;  %v1192_v0 = vpop.permute.xlu1 %1191 }
 0x452   : > { %v1074_v54 = vsel %vm446_vm6, %v3233_v48, %v3229_v26 }
 0x455   : > { %v1194_v7 = vpop.permute.xlu0 %1193  ;;  %v1196_v42 = vpop.permute.xlu1 %1195 }
 0x456   : > { %v1199_v3 = vsel %vm446_vm6, %v1192_v0, %v1196_v42  ;;  %v1201_v43 = vsel %vm446_vm6, %v1196_v42, %v1192_v0  ;;  %v995_v0 = vmul.f32 %v3069_v6, %v2579_v19  ;;  %v1040_v6 = vsel %vm390_vm4, %v3185_v63, %v3189_v16 }
 0x457   : > { %v1203_v20 = vmul.f32 %v1199_v3, %v2772_v30  ;;  %v1204_v21 = vmul.f32 %v1201_v43, %v2775_v33 }
 0x459   : > { %v1198_v5 = vpop.permute.xlu0 %1197  ;;  %v986_v44 = vpop.permute.xlu1 %985 }
 0x45a   : > { %v1200_v15 = vsel %vm446_vm6, %v1194_v7, %v1198_v5  ;;  %v1202_v18 = vsel %vm446_vm6, %v1198_v5, %v1194_v7  ;;  %v996_v7 = vmul.f32 %v3065_v11, %v2570_v17 }
 0x45b   : > { %v1205_v59 = vmul.f32 %v1200_v15, %v2772_v30  ;;  %v1206_v53 = vmul.f32 %v1202_v18, %v2775_v33 }
 0x45d   : > { %v1884_v47 = vpack.c.bf16 %v1205_v59, %v1203_v20  ;;  %v3247_v60 = vpop.permute.xlu0 %1081  ;;  %v990_v31 = vpop.permute.xlu1 %989  ;;  %v1882_v32 = vpack.c.bf16 %v1206_v53, %v1204_v21  ;;  %v1046_v20 = vmul.f32 %v1040_v6, %v2699_v13  ;;  %v1041_v21 = vsel %vm390_vm4, %v3187_v8, %v3175_v9 }
 0x45e   : > { %v992_v25 = vsel %vm306_vm1, %v986_v44, %v990_v31  ;;  %v994_v40 = vsel %vm306_vm1, %v990_v31, %v986_v44  ;;  %v1042_v44 = vsel %vm390_vm4, %v3189_v16, %v3185_v63  ;;  %v1043_v16 = vmul.f32 %v1041_v21, %v2696_v12 }
 0x45f   : > { %v997_v42 = vmul.f32 %v994_v40, %v2579_v19  ;;  %v998_v3 = vmul.f32 %v992_v25, %v2570_v17  ;;  %1883 = vmatprep.subr.bf16.mxu1 %v1882_v32  ;;  %v1039_v19 = vsel %vm390_vm4, %v3175_v9, %v3187_v8  ;;  %v1045_v1 = vmul.f32 %v1042_v44, %v2696_v12 }
 0x460   : > { %1885 = vmatpush1.bf16.msra.mxu1 %v1884_v47  ;;  %v1044_v2 = vmul.f32 %v1039_v19, %v2699_v13  ;;  %v1058_v9 = vsel %vm418_vm5, %v3211_v4, %v3205_v38  ;;  %v1057_v12 = vsel %vm418_vm5, %v3207_v14, %v3195_v34 }
 0x461   : > { %v1824_v43 = vpack.c.bf16 %v997_v42, %v995_v0  ;;  %v3259_v5 = vpop.permute.xlu0 %1085  ;;  %v3261_v15 = vpop.permute.xlu1 %1079  ;;  %v1822_v18 = vpack.c.bf16 %v998_v3, %v996_v7  ;;  %v1836_v58 = vpack.c.bf16 %v1045_v1, %v1043_v16  ;;  %v1062_v52 = vmul.f32 %v1058_v9, %v2739_v50 }
 0x462   : > { %v1834_v8 = vpack.c.bf16 %v1046_v20, %v1044_v2  ;;  %v1073_v7 = vsel %vm446_vm6, %v3231_v51, %v3219_v22  ;;  %v1840_v42 = vpack.c.bf16 %v2959_v55, %v2917_v23  ;;  %v1071_v23 = vsel %vm446_vm6, %v3219_v22, %v3231_v51 }
 0x463   : > { %1823 = vmatprep.subr.bf16.mxu0 %v1822_v18  ;;  %v1076_v55 = vmul.f32 %v1073_v7, %v2775_v33  ;;  %v1075_v51 = vmul.f32 %v1071_v23, %v2772_v30  ;;  %v1088_v44 = vsel %vm474_vm7, %v3247_v60, %v3259_v5 }
 0x464   : > { %1825 = vmatpush1.bf16.msra.mxu0 %v1824_v43 }
 0x465   : > { %v1210_v11 = vpop.permute.xlu0 %1209  ;;  %1827 = vmatprep.subr.bf16.mxu0 %v1826_v57  ;;  %v1084_v17 = vpop.permute.xlu1 %1083 }
 0x466   : > { %v1089_v43 = vsel %vm474_vm7, %v1084_v17, %v3261_v15 }
 0x467   : > { %v1092_v19 = vmul.f32 %v1089_v43, %v2809_v62 }
 0x468   : > { %1829 = vmatpush1.bf16.msra.mxu0 %v1828_v36 }
 0x469   : > { %v1214_v57 = vpop.permute.xlu0 %1213  ;;  %1831 = vmatprep.subr.bf16.mxu0 %v1830_v41  ;;  %v1208_v63 = vpop.permute.xlu1 %1207  ;;  %v1056_v41 = vsel %vm418_vm5, %v3205_v38, %v3211_v4  ;;  %v1055_v38 = vsel %vm418_vm5, %v3195_v34, %v3207_v14  ;;  %v1060_v4 = vmul.f32 %v1057_v12, %v2739_v50  ;;  %v1072_v50 = vsel %vm446_vm6, %v3229_v26, %v3233_v48 }
 0x46a   : > { %v1216_v56 = vsel %vm474_vm7, %v1210_v11, %v1214_v57  ;;  %v1218_v13 = vsel %vm474_vm7, %v1214_v57, %v1210_v11  ;;  %v1061_v0 = vmul.f32 %v1056_v41, %v2736_v49  ;;  %v1078_v34 = vmul.f32 %v1074_v54, %v2775_v33 }
 0x46b   : > { %v1221_v59 = vmul.f32 %v1216_v56, %v2806_v61  ;;  %v1222_v53 = vmul.f32 %v1218_v13, %v2809_v62  ;;  %v1842_v14 = vpack.c.bf16 %v1062_v52, %v1060_v4  ;;  %v1059_v3 = vmul.f32 %v1055_v38, %v2736_v49 }
 0x46c   : > { %1833 = vmatpush1.bf16.msra.mxu0 %v1832_v35  ;;  %v1077_v6 = vmul.f32 %v1072_v50, %v2772_v30  ;;  %v1090_v49 = vsel %vm474_vm7, %v3259_v5, %v3247_v60  ;;  %v1087_v11 = vsel %vm474_vm7, %v3261_v15, %v1084_v17  ;;  %v1846_v22 = vpack.c.bf16 %v1078_v34, %v1076_v55 }
 0x46d   : > { %v3307_v36 = vpop.permute.xlu0 %1097  ;;  %1835 = vmatprep.subr.bf16.mxu0 %v1834_v8  ;;  %v1212_v37 = vpop.permute.xlu1 %1211  ;;  %v1844_v18 = vpack.c.bf16 %v1061_v0, %v1059_v3  ;;  %v1094_v20 = vmul.f32 %v1090_v49, %v2809_v62  ;;  %v1091_v21 = vmul.f32 %v1087_v11, %v2806_v61  ;;  %v1093_v57 = vmul.f32 %v1088_v44, %v2806_v61 }
 0x46e   : > { %v1215_v24 = vsel %vm474_vm7, %v1208_v63, %v1212_v37  ;;  %v1217_v35 = vsel %vm474_vm7, %v1212_v37, %v1208_v63  ;;  %v1848_v1 = vpack.c.bf16 %v1077_v6, %v1075_v51 }
 0x46f   : > { %v1219_v47 = vmul.f32 %v1215_v24, %v2806_v61  ;;  %v1220_v27 = vmul.f32 %v1217_v35, %v2809_v62  ;;  %v1850_v5 = vpack.c.bf16 %v1094_v20, %v1092_v19  ;;  %v1852_v9 = vpack.c.bf16 %v1093_v57, %v1091_v21 }
 0x470   : > { %1837 = vmatpush1.bf16.msra.mxu0 %v1836_v58 }
 0x471   : > { %v1888_v31 = vpack.c.bf16 %v1221_v59, %v1219_v47  ;;  %v1102_v32 = vpop.permute.xlu0 %1101  ;;  %1839 = vmatprep.subr.bf16.mxu0 %v1838_v29  ;;  %v1096_v25 = vpop.permute.xlu1 %1095  ;;  %v1886_v40 = vpack.c.bf16 %v1222_v53, %v1220_v27  ;;  %v1242_v53 = vld [vmem:[#allocation7 + $0x18] sm:$0xff]  ;;  %v1241_v47 = vld [vmem:[#allocation7 + $0x10] sm:$0xff] }
 0x472   : > { %v1106_v15 = vsel %vm502_vm8, %v1102_v32, %v3307_v36  ;;  %v1104_v8 = vsel %vm502_vm8, %v3307_v36, %v1102_v32 }
 0x473   : > { %1887 = vmatprep.subr.bf16.mxu1 %v1886_v40  ;;  %v1110_v62 = vmul.f32 %v1106_v15, %v2843_v46  ;;  %v1109_v36 = vmul.f32 %v1104_v8, %v2840_v45 }
 0x474   : > { %1841 = vmatpush1.bf16.msra.mxu0 %v1840_v42  ;;  %1889 = vmatpush1.bf16.msra.mxu1 %v1888_v31 }
 0x475   : > { %v1226_v26 = vpop.permute.xlu0 %1225  ;;  %1843 = vmatprep.subr.bf16.mxu0 %v1842_v14  ;;  %v1100_v48 = vpop.permute.xlu1 %1099 }
 0x476   : > { %v1105_v33 = vsel %vm502_vm8, %v1100_v48, %v1096_v25  ;;  %v1103_v60 = vsel %vm502_vm8, %v1096_v25, %v1100_v48 }
 0x477   : > { %v1108_v30 = vmul.f32 %v1105_v33, %v2843_v46  ;;  %v1107_v56 = vmul.f32 %v1103_v60, %v2840_v45 }
 0x478   : > { %1845 = vmatpush1.bf16.msra.mxu0 %v1844_v18  ;;  %v2186_v18 = vmov 4  }
 0x479   : > { %v1230_v17 = vpop.permute.xlu0 %1229  ;;  %1847 = vmatprep.subr.bf16.mxu0 %v1846_v22  ;;  %v1224_v2 = vpop.permute.xlu1 %1223  ;;  %v1854_v12 = vpack.c.bf16 %v1110_v62, %v1108_v30  ;;  %v1856_v59 = vpack.c.bf16 %v1109_v36, %v1107_v56  ;;  %1985 = vset.pattern.permute.xlu1 %v2186_v18 }
 0x47a   : > { %v1232_v63 = vsel %vm502_vm8, %v1226_v26, %v1230_v17  ;;  %v1234_v16 = vsel %vm502_vm8, %v1230_v17, %v1226_v26  ;;  %1986 = vset.pattern.permute.xlu0 %v2186_v18 }
 0x47b   : > { %v1237_v37 = vmul.f32 %v1232_v63, %v2840_v45  ;;  %v1238_v29 = vmul.f32 %v1234_v16, %v2843_v46 }
 0x47c   : > { %1849 = vmatpush1.bf16.msra.mxu0 %v1848_v1 }
 0x47d   : > { %1851 = vmatprep.subr.bf16.mxu0 %v1850_v5  ;;  %v1228_v61 = vpop.permute.xlu1 %1227 }
 0x47e   : > { %v1231_v13 = vsel %vm502_vm8, %v1224_v2, %v1228_v61  ;;  %v1233_v58 = vsel %vm502_vm8, %v1228_v61, %v1224_v2 }
 0x47f   : > { %v1235_v41 = vmul.f32 %v1231_v13, %v2840_v45  ;;  %v1236_v52 = vmul.f32 %v1233_v58, %v2843_v46 }
 0x480   : > { %1853 = vmatpush1.bf16.msra.mxu0 %v1852_v9 }
 0x481   : > { %v1892_v24 = vpack.c.bf16 %v1237_v37, %v1235_v41  ;;  %1855 = vmatprep.subr.bf16.mxu0 %v1854_v12  ;;  %v1890_v35 = vpack.c.bf16 %v1238_v29, %v1236_v52 }
 0x483   : > { %1891 = vmatprep.subr.bf16.mxu1 %v1890_v35 }
 0x484   : > { %1857 = vmatpush1.bf16.msra.mxu0 %v1856_v59  ;;  %1893 = vmatpush1.bf16.msra.mxu1 %v1892_v24 }
 0x487   : > { %1322 = vmatmul.mubr.f32.vlgmr.msra.gmra.mrb[4].mxu0 %v1239_v10  ;;  %1399 = vmatmul.mubr.f32.vlgmr.msra.gmra.mrb[4].mxu1 %v1239_v10 }
 0x488   : > { %1729 = vmatprep.mubr.msk.f32.mxu0 %vm669_vm0, %v1242_v53  ;;  %1731 = vmatprep.mubr.msk.f32.mxu1 %vm669_vm0, %v1242_v53 }
 0x48a   : > { %v1249_v40 = vpop.permute.xlu0 %1248 }
 0x48b   : > { %1328 = vmatmul.mubr.f32.gmra.mrb[6].mxu0 %v1241_v47  ;;  %1405 = vmatmul.mubr.f32.gmra.mrb[6].mxu1 %v1241_v47 }
 0x48e   : > { %v1245_v45 = vpop.permute.xlu1 %1244 }
 0x55a   : > { %v1323_v46 = vpop.f32.mrb[4].mxu0  ;;  %v1400_v27 = vpop.f32.mrb[4].mxu1 }
 0x55b   : > { %v1324_v54 = vadd.f32 %v1323_v46, %v1245_v45  ;;  %v1325_v38 = vpop.f32.mrb[5].mxu0  ;;  %v1401_v4 = vadd.f32 %v1400_v27, %v1245_v45  ;;  %v1402_v31 = vpop.f32.mrb[5].mxu1 }
 0x55c   : > { %v1326_v32 = vadd.f32 %v1325_v38, %v1245_v45  ;;  %v1403_v25 = vadd.f32 %v1402_v31, %v1245_v45 }
 0x55e   : > { %v1411_v0 = vadd.f32 %v1326_v32, %v1324_v54  ;;  %v1439_v7 = vadd.f32 %v1403_v25, %v1401_v4  ;;  %v1329_v42 = vpop.f32.mrb[6].mxu0  ;;  %v1406_v50 = vpop.f32.mrb[6].mxu1 }
 0x55f   : > { %v1330_v34 = vadd.f32 %v1329_v42, %v1249_v40  ;;  %v1407_v14 = vadd.f32 %v1406_v50, %v1249_v40  ;;  %v1331_v3 = vpop.f32.mrb[7].mxu0  ;;  %v1408_v43 = vpop.f32.mrb[7].mxu1  ;;  %v2187_v50 = vmov 5  }
 0x560   : > { %v1332_v23 = vadd.f32 %v1331_v3, %v1249_v40  ;;  %v1409_v55 = vadd.f32 %v1408_v43, %v1249_v40  ;;  %1440 = vadd.xlane.f32.xlu0 %v1439_v7  ;;  %1412 = vadd.xlane.f32.xlu1 %v1411_v0 }
 0x562   : > { %v1467_v26 = vadd.f32 %v1332_v23, %v1330_v34  ;;  %v1495_v48 = vadd.f32 %v1409_v55, %v1407_v14 }
 0x564   : > { %1496 = vadd.xlane.f32.xlu0 %v1495_v48  ;;  %1468 = vadd.xlane.f32.xlu1 %v1467_v26 }
 0x5ed   : > { %v1441_v6 = vpop.xlane.xlu0 %1440  ;;  %v1413_v49 = vpop.xlane.xlu1 %1412 }
 0x5ee   : > { %v1442_v11 = vrot.slane %v1441_v6, 4  ;;  %v1414_v19 = vrot.slane %v1413_v49, 4 }
 0x5f0   : > { %v1443_v33 = vadd.f32 %v1442_v11, %v1441_v6  ;;  %v1415_v22 = vadd.f32 %v1414_v19, %v1413_v49 }
 0x5f1   : > { %v1497_v51 = vpop.xlane.xlu0 %1496  ;;  %v1469_v44 = vpop.xlane.xlu1 %1468 }
 0x5f2   : > { %v1444_v20 = vrot.slane %v1443_v33, 2  ;;  %v1416_v21 = vrot.slane %v1415_v22, 2  ;;  %v1498_v15 = vrot.slane %v1497_v51, 4  ;;  %v1470_v17 = vrot.slane %v1469_v44, 4 }
 0x5f4   : > { %v1445_v2 = vadd.f32 %v1444_v20, %v1443_v33  ;;  %v1417_v1 = vadd.f32 %v1416_v21, %v1415_v22  ;;  %v1499_v30 = vadd.f32 %v1498_v15, %v1497_v51  ;;  %v1471_v57 = vadd.f32 %v1470_v17, %v1469_v44 }
 0x5f6   : > { %v1446_v60 = vrot.slane %v1445_v2, 1  ;;  %v1418_v5 = vrot.slane %v1417_v1, 1  ;;  %v1500_v62 = vrot.slane %v1499_v30, 2  ;;  %v1472_v63 = vrot.slane %v1471_v57, 2 }
 0x5f8   : > { %v1447_v16 = vadd.f32 %v1446_v60, %v1445_v2  ;;  %v1419_v9 = vadd.f32 %v1418_v5, %v1417_v1  ;;  %v1501_v8 = vadd.f32 %v1500_v62, %v1499_v30  ;;  %v1473_v61 = vadd.f32 %v1472_v63, %v1471_v57 }
 0x5fa   : > { %v1448_v56 = vmul.f32 0.00048828125, %v1447_v16  ;;  %v1420_v13 = vmul.f32 0.00048828125, %v1419_v9  ;;  %v1502_v58 = vrot.slane %v1501_v8, 1  ;;  %v1474_v12 = vrot.slane %v1473_v61, 1 }
 0x5fc   : > { %v1503_v37 = vadd.f32 %v1502_v58, %v1501_v8  ;;  %v1475_v29 = vadd.f32 %v1474_v12, %v1473_v61  ;;  %v3399_v41 = vsub.f32 %v1401_v4, %v1448_v56  ;;  %v3401_v52 = vsub.f32 %v1403_v25, %v1448_v56 }
 0x5fd   : > { %v3403_v36 = vsub.f32 %v1324_v54, %v1420_v13  ;;  %v3405_v24 = vsub.f32 %v1326_v32, %v1420_v13 }
 0x5fe   : > { %v1504_v35 = vmul.f32 0.00048828125, %v1503_v37  ;;  %v1476_v59 = vmul.f32 0.00048828125, %v1475_v29  ;;  %v1451_v10 = vmul.f32 %v3399_v41, %v3399_v41  ;;  %v1452_v53 = vmul.f32 %v3401_v52, %v3401_v52 }
 0x5ff   : > { %v1423_v47 = vmul.f32 %v3403_v36, %v3403_v36  ;;  %v1424_v45 = vmul.f32 %v3405_v24, %v3405_v24 }
 0x600   : > { %v1453_v46 = vadd.f32 %v1452_v53, %v1451_v10  ;;  %v3415_v27 = vsub.f32 %v1407_v14, %v1504_v35  ;;  %v3417_v54 = vsub.f32 %v1409_v55, %v1504_v35  ;;  %v3419_v38 = vsub.f32 %v1330_v34, %v1476_v59 }
 0x601   : > { %v1425_v4 = vadd.f32 %v1424_v45, %v1423_v47  ;;  %v3421_v31 = vsub.f32 %v1332_v23, %v1476_v59 }
 0x602   : > { %1454 = vadd.xlane.f32.xlu0 %v1453_v46  ;;  %v1507_v32 = vmul.f32 %v3415_v27, %v3415_v27  ;;  %v1508_v25 = vmul.f32 %v3417_v54, %v3417_v54  ;;  %v1479_v40 = vmul.f32 %v3419_v38, %v3419_v38 }
 0x603   : > { %1426 = vadd.xlane.f32.xlu1 %v1425_v4  ;;  %v1480_v0 = vmul.f32 %v3421_v31, %v3421_v31 }
 0x604   : > { %v1509_v7 = vadd.f32 %v1508_v25, %v1507_v32 }
 0x605   : > { %v1481_v42 = vadd.f32 %v1480_v0, %v1479_v40 }
 0x606   : > { %1510 = vadd.xlane.f32.xlu0 %v1509_v7 }
 0x607   : > { %1482 = vadd.xlane.f32.xlu1 %v1481_v42  ;;  %v1733_v42 = vld [vmem:[%s2407_s12 + $0x28] sm:$0xff] }
 0x618   : > { %1524 = vperm.xlu1 %1985, %v3112_v39  }
 0x61c   : > { %1987 = vset.pattern.permute.xlu1 %v2187_v50  ;;  %1528 = vperm.xlu0 %1986, %v3102_v28  }
 0x61d   : > { %1540 = vperm.xlu1 %1987, %v3112_v39  }
 0x620   : > { %1988 = vset.pattern.permute.xlu0 %v2187_v50 }
 0x621   : > { %1544 = vperm.xlu1 %1987, %v3102_v28  }
 0x68f   : > { %v1455_v34 = vpop.xlane.xlu0 %1454 }
 0x690   : > { %v1456_v14 = vrot.slane %v1455_v34, 4  ;;  %v1427_v3 = vpop.xlane.xlu1 %1426 }
 0x691   : > { %v1428_v43 = vrot.slane %v1427_v3, 4 }
 0x692   : > { %v1457_v23 = vadd.f32 %v1456_v14, %v1455_v34 }
 0x693   : > { %v1429_v55 = vadd.f32 %v1428_v43, %v1427_v3  ;;  %v1511_v26 = vpop.xlane.xlu0 %1510 }
 0x694   : > { %v1458_v48 = vrot.slane %v1457_v23, 2  ;;  %v1512_v18 = vrot.slane %v1511_v26, 4  ;;  %v1483_v6 = vpop.xlane.xlu1 %1482 }
 0x695   : > { %v1430_v49 = vrot.slane %v1429_v55, 2  ;;  %v1484_v11 = vrot.slane %v1483_v6, 4 }
 0x696   : > { %v1459_v19 = vadd.f32 %v1458_v48, %v1457_v23  ;;  %v1513_v33 = vadd.f32 %v1512_v18, %v1511_v26 }
 0x697   : > { %v1431_v22 = vadd.f32 %v1430_v49, %v1429_v55  ;;  %v1485_v51 = vadd.f32 %v1484_v11, %v1483_v6 }
 0x698   : > { %v1460_v39 = vrot.slane %v1459_v19, 1  ;;  %v1514_v44 = vrot.slane %v1513_v33, 2  ;;  %v1525_v13 = vpop.permute.xlu1 %1524 }
 0x699   : > { %v1432_v20 = vrot.slane %v1431_v22, 1  ;;  %v1486_v28 = vrot.slane %v1485_v51, 2 }
 0x69a   : > { %v1461_v21 = vadd.f32 %v1460_v39, %v1459_v19  ;;  %v1515_v15 = vadd.f32 %v1514_v44, %v1513_v33  ;;  %v2007_v19 = vld [vmem:[%s2407_s12] sm:$0xff] }
 0x69b   : > { %v1433_v17 = vadd.f32 %v1432_v20, %v1431_v22  ;;  %v1487_v2 = vadd.f32 %v1486_v28, %v1485_v51  ;;  %v1529_v32 = vpop.permute.xlu0 %1528  ;;  %v1734_v22 = vld [vmem:[%s2407_s12 + $0x30] sm:$0xff]  ;;  %v1735_v51 = vld [vmem:[%s2407_s12 + $0x38] sm:$0xff] }
 0x69c   : > { %v1462_v1 = vmul.f32 0.00048828125, %v1461_v21  ;;  %v1516_v30 = vrot.slane %v1515_v15, 1  ;;  %v1541_v10 = vpop.permute.xlu1 %1540 }
 0x69d   : > { %v1434_v57 = vmul.f32 0.00048828125, %v1433_v17  ;;  %v1488_v60 = vrot.slane %v1487_v2, 1 }
 0x69e   : > { %v1463_v5 = vadd.f32 1e-05, %v1462_v1  ;;  %v1517_v62 = vadd.f32 %v1516_v30, %v1515_v15 }
 0x69f   : > { %v1435_v63 = vadd.f32 1e-05, %v1434_v57  ;;  %v1489_v16 = vadd.f32 %v1488_v60, %v1487_v2 }
 0x6a0   : > { %1997 = vrsqrt.f32 %v1463_v5  ;;  %v1518_v9 = vmul.f32 0.00048828125, %v1517_v62  ;;  %v1545_v26 = vpop.permute.xlu1 %1544  ;;  %v2009_v5 = vld [vmem:[%s2407_s12 + $0x10] sm:$0xff] }
 0x6a1   : > { %1999 = vrsqrt.f32 %v1435_v63  ;;  %v1490_v8 = vmul.f32 0.00048828125, %v1489_v16  ;;  %v2010_v63 = vld [vmem:[%s2407_s12 + $0x18] sm:$0xff] }
 0x6a2   : > { %v1519_v61 = vadd.f32 1e-05, %v1518_v9 }
 0x6a3   : > { %v1491_v56 = vadd.f32 1e-05, %v1490_v8 }
 0x6a4   : > { %2001 = vrsqrt.f32 %v1519_v61 }
 0x6a5   : > { %2003 = vrsqrt.f32 %v1491_v56 }
 0x6aa   : > { %v1998_v58 = vpop.eup %1997 }
 0x6ab   : > { %v2000_v12 = vpop.eup %1999  ;;  %v1465_v37 = vmul.f32 %v1998_v58, %v3399_v41  ;;  %v1466_v29 = vmul.f32 %v1998_v58, %v3401_v52  ;;  %v1732_v52 = vld [vmem:[%s2407_s12 + $0x20] sm:$0xff] }
 0x6ac   : > { %v1437_v35 = vmul.f32 %v2000_v12, %v3403_v36  ;;  %v1438_v59 = vmul.f32 %v2000_v12, %v3405_v24 }
 0x6ad   : > { %v1533_v53 = vmul.f32 %v1525_v13, %v1465_v37  ;;  %v1534_v47 = vmul.f32 %v1525_v13, %v1466_v29 }
 0x6ae   : > { %v2002_v45 = vpop.eup %2001  ;;  %v1531_v46 = vmul.f32 %v1525_v13, %v1437_v35  ;;  %v1532_v4 = vmul.f32 %v1525_v13, %v1438_v59 }
 0x6af   : > { %v2004_v25 = vpop.eup %2003  ;;  %v1549_v40 = vadd.f32 %v1541_v10, %v1533_v53  ;;  %v1550_v0 = vadd.f32 %v1541_v10, %v1534_v47  ;;  %v1521_v41 = vmul.f32 %v2002_v45, %v3415_v27  ;;  %v1522_v7 = vmul.f32 %v2002_v45, %v3417_v54 }
 0x6b0   : > { %v1547_v50 = vadd.f32 %v1541_v10, %v1531_v46  ;;  %v1548_v36 = vadd.f32 %v1541_v10, %v1532_v4  ;;  %v1493_v24 = vmul.f32 %v2004_v25, %v3419_v38  ;;  %v1494_v34 = vmul.f32 %v2004_v25, %v3421_v31  ;;  %v2008_v31 = vld [vmem:[%s2407_s12 + $0x8] sm:$0xff]  ;;  %s2097_s12 = scalar_lea.vmem %s3459_s9, 1024 }
 0x6b1   : > { %v1557_v14 = vmax.f32 %v1549_v40, 0.0  ;;  %v1558_v3 = vmax.f32 %v1550_v0, 0.0  ;;  %v1537_v43 = vmul.f32 %v1529_v32, %v1521_v41  ;;  %v1538_v23 = vmul.f32 %v1529_v32, %v1522_v7  ;;  %p2098_p11 = scmp.ne.s32.totalorder %s3459_s9, %s2097_s12  ;;  %p2105_p9 = scmp.lt.s32.totalorder %s2103_s8, %s2097_s12 }
 0x6b2   : > { %v1555_v55 = vmax.f32 %v1547_v50, 0.0  ;;  %v1556_v27 = vmax.f32 %v1548_v36, 0.0  ;;  %v1535_v54 = vmul.f32 %v1529_v32, %v1493_v24  ;;  %v1536_v48 = vmul.f32 %v1529_v32, %v1494_v34 }
 0x6b3   : > { %v1579_v18 = vadd.f32 %v1732_v52, %v1557_v14  ;;  %v1580_v6 = vadd.f32 %v1733_v42, %v1558_v3  ;;  %v1553_v49 = vadd.f32 %v1545_v26, %v1537_v43  ;;  %v1554_v11 = vadd.f32 %v1545_v26, %v1538_v23  ;;  %p2099_p2 = pnand %p2098_p11, %p3523_p0  ;;  %p2106_p12 = por %p2105_p9, %p2104_p7 }
 0x6b4   : > { %v1563_v38 = vadd.f32 %v2007_v19, %v1555_v55  ;;  %v1564_v33 = vadd.f32 %v2008_v31, %v1556_v27  ;;  %v1551_v39 = vadd.f32 %v1545_v26, %v1535_v54  ;;  %v1552_v44 = vadd.f32 %v1545_v26, %v1536_v48 }
 0x6b5   : > { %v1583_v20 = vmax.f32 %v1579_v18, 0.0  ;;  %v1584_v28 = vmax.f32 %v1580_v6, 0.0  ;;  %v1561_v21 = vmax.f32 %v1553_v49, 0.0  ;;  %v1562_v15 = vmax.f32 %v1554_v11, 0.0  ;;  %p2100_p3 = pneg %p2099_p2 }
 0x6b6   : > { %v1567_v17 = vmax.f32 %v1563_v38, 0.0  ;;  %v1568_v2 = vmax.f32 %v1564_v33, 0.0  ;;  %v1559_v1 = vmax.f32 %v1551_v39, 0.0  ;;  %v1560_v30 = vmax.f32 %v1552_v44, 0.0 }
 0x6b7   : > { %1736 = vst [vmem:[%s272_s13 + $0x20] sm:$0xff] %v1583_v20  ;;  %1737 = vst [vmem:[%s272_s13 + $0x28] sm:$0xff] %v1584_v28  ;;  %v1581_v57 = vadd.f32 %v1734_v22, %v1561_v21  ;;  %v1582_v60 = vadd.f32 %v1735_v51, %v1562_v15  ;;  %p2107_p1 = pnand %p2106_p12, %p2100_p3 }
 0x6b8   : > { %1571 = vst [vmem:[%s272_s13] sm:$0xff] %v1567_v17  ;;  %1572 = vst [vmem:[%s272_s13 + $0x8] sm:$0xff] %v1568_v2  ;;  %v1565_v62 = vadd.f32 %v2009_v5, %v1559_v1  ;;  %v1566_v16 = vadd.f32 %v2010_v63, %v1560_v30 }
 0x6b9   : > { %v1585_v9 = vmax.f32 %v1581_v57, 0.0  ;;  %v1586_v8 = vmax.f32 %v1582_v60, 0.0 }
 0x6ba   : > { %v1569_v61 = vmax.f32 %v1565_v62, 0.0  ;;  %v1570_v56 = vmax.f32 %v1566_v16, 0.0 }
 0x6bb   : > { %1738 = vst [vmem:[%s272_s13 + $0x30] sm:$0xff] %v1585_v9  ;;  %1739 = vst [vmem:[%s272_s13 + $0x38] sm:$0xff] %v1586_v8 }
 0x6bc   : > { %1573 = vst [vmem:[%s272_s13 + $0x10] sm:$0xff] %v1569_v61  ;;  %1574 = vst [vmem:[%s272_s13 + $0x18] sm:$0xff] %v1570_v56 }
 0x6bd   : > { %2110 = shalt.err (!%p2107_p1)
}
 0x6be   : > { %s2111_s24 = scalar_lea.hbm %s3457_s22, 1024  ;;  %s2115_s10 = scalar_lea.hbm %s3509_s5, 2048 }
 0x6bf   : > { %p2112_p13 = scmp.ne.s32.totalorder %s3457_s22, %s2111_s24  ;;  %p2116_p4 = scmp.lt.u32.totalorder %s3457_s22, %s3509_s5 }
 0x6c0   : > { %p2117_p5 = scmp.lt.u32.totalorder %s2115_s10, %s2111_s24  ;;  %p2119_p11 = scmp.lt.u32.totalorder %s2111_s24, %s3457_s22 }
 0x6c1   : > { %p2113_p6 = pnand %p2112_p13, %p3523_p0 }
 0x6c2   : > { %p2118_p8 = por %p2117_p5, %p2116_p4 }
 0x6c3   : > { %p2114_p10 = pneg %p2113_p6 }
 0x6c4   : > { %p2120_p2 = por %p2119_p11, %p2118_p8 }
 0x6c6   : > { %p2121_p3 = pnand %p2120_p2, %p2114_p10 }
 0x6c8   : > { %2124 = shalt.err (!%p2121_p3)
}
 0x6c9   : > { %s2189_s30 = smov 256  }
 0x6ca   : > { %1904 = dma.vmem_to_hbm [thread:$0]  (%p3523_p0), %s3459_s9, 1024, %s3457_s22, %s1593_s6, %s2189_s30, %s2189_s30, %s2175_s26  }
 0x6cb PF: > { %s1622_s11 = sand.u32 1, %s2155_s18   ;;  %p3524_p7 = scmp.ne.s32.totalorder %s3514_s25, 0 }
 0x6cc   : > { %p3525_p9 = scmp.ge.s32.totalorder %s2167_s21, 2  ;;  %s1623_s12 = scalar_lea.sflag [#allocation4], %s1622_s11 }
 0x6ce   : > { %p1918_p12 = pnand %p3525_p9, %p3524_p7 }
 0x6d0   : > { %2150 = dma.done.wait (!%p1918_p12), %s1623_s12, 1024  }
 0x6d1   : > { %2152 = vsyncadd (!%p1918_p12), %s1623_s12, 4294966272  ;;  %p19_p1 = scmp.ge.s32.totalorder %s2336_s29, 4   ;;  %s3526_s18 = smov %s2159_s19 }
 0x6d2   : > { %s3527_s19 = smov %s2163_s20  ;;  %s3528_s20 = smov %s2352_s27 }
 0x6d3   : > { %s3529_s21 = smov %s2336_s29  ;;  %21 = sbr.rel (!%p19_p1) target bundleno = 6 (0x6), region = 102 }
 0x6da   :  { %1628 = vsyncpa [#allocation3], 1 }
 0x6db   :  { %1630 = vsyncpa [#allocation3 + $0x1], 1 }
 0x6dc   :  { %1631 = vsyncpa [#allocation6], 1 }
 0x6dd   :  { %1632 = vsyncpa [#allocation4], 1 }
 0x6de   :  { %1634 = vsyncpa [#allocation4 + $0x1], 1 }

</bundles_post_ra>
